<compile_context>
chip_gen: v5e
topology: v5e:2x2
jax: 0.10.0
libtpu: 0.0.40
codegen_flags: <defaults>
</compile_context>

<pallas_src>
import functools

import jax
import jax.numpy as jnp
from jax.experimental import pallas as pl
from jax.experimental.pallas import tpu as pltpu


def _encoder_layer_kernel(
    x_ref, pos_ref,
    wq_ref, bq_ref, wk_ref, bk_ref, wv_ref, bv_ref,
    wo_ref, bo_ref,
    w1_ref, b1_ref, w2_ref, b2_ref,
    g1_ref, be1_ref, g2_ref, be2_ref,
    o_ref,
    *, nhead, eps,
):
    f32 = jnp.float32
    bf16 = jnp.bfloat16

    bb, S, D = x_ref.shape
    R = bb * S
    hd = D // nhead
    scale = 1.0 / jnp.sqrt(jnp.float32(hd))

    # Flatten the batch sub-block into the row (sublane) dim so every matmul in
    # the layer runs over bb*S rows in one shot.
    x = x_ref[...].astype(f32).reshape(R, D)        # (R, D)
    pos = pos_ref[...].astype(f32).reshape(R, D)

    qk_in = (x + pos).astype(bf16)   # with_pos_embed(src, pos); value path uses src only
    x_bf = x.astype(bf16)

    # --- input projections: bf16 operands on the MXU, f32 accumulation ---
    q = jnp.dot(qk_in, wq_ref[...], preferred_element_type=f32) + bq_ref[0]
    k = jnp.dot(qk_in, wk_ref[...], preferred_element_type=f32) + bk_ref[0]
    v = jnp.dot(x_bf, wv_ref[...], preferred_element_type=f32) + bv_ref[0]

    # --- batched multi-head attention (heads x batches = einsum batch dim) ---
    # (R, D) -> (H*bb, S, hd); batch index g = h*bb + b, so each g is one
    # (head, batch) pair and attention never mixes rows across batch elements.
    def split_heads(t):
        return (t.astype(bf16)
                 .reshape(R, nhead, hd)
                 .transpose(1, 0, 2)              # (H, bb*S, hd)
                 .reshape(nhead * bb, S, hd))     # (H*bb, S, hd)

    q3 = split_heads(q)
    k3 = split_heads(k)
    v3 = split_heads(v)

    scores = jnp.einsum('gqd,gkd->gqk', q3, k3,
                        preferred_element_type=f32) * scale        # (H*bb, S, S) f32
    m = jnp.max(scores, axis=-1, keepdims=True)
    e = jnp.exp(scores - m)
    denom = jnp.sum(e, axis=-1, keepdims=True)
    attn = e * pl.reciprocal(denom, approx=True)                   # divide -> EUP slot

    ctx = jnp.einsum('gqk,gkd->gqd', attn.astype(bf16), v3,
                     preferred_element_type=f32)                   # (H*bb, S, hd) f32

    # Merge heads back (inverse relayout of split_heads) and project.
    attn_out = (ctx.reshape(nhead, R, hd)
                   .transpose(1, 0, 2)
                   .reshape(R, D)
                   .astype(bf16))                                  # (R, D)
    src2 = jnp.dot(attn_out, wo_ref[...], preferred_element_type=f32) + bo_ref[0]

    # --- residual + LayerNorm 1 (f32; dropout1 is identity at inference) ---
    src = x + src2
    mu = jnp.mean(src, axis=-1, keepdims=True)
    var = jnp.mean((src - mu) ** 2, axis=-1, keepdims=True)
    src = (src - mu) * jax.lax.rsqrt(var + eps) * g1_ref[0] + be1_ref[0]

    # --- feed-forward: linear2(relu(linear1(src))), bf16 matmuls / f32 acc ---
    h1 = jnp.dot(src.astype(bf16), w1_ref[...], preferred_element_type=f32) + b1_ref[0]
    h1 = jnp.maximum(h1, 0.0)
    src2 = jnp.dot(h1.astype(bf16), w2_ref[...], preferred_element_type=f32) + b2_ref[0]

    # --- residual + LayerNorm 2 ---
    src = src + src2
    mu = jnp.mean(src, axis=-1, keepdims=True)
    var = jnp.mean((src - mu) ** 2, axis=-1, keepdims=True)
    src = (src - mu) * jax.lax.rsqrt(var + eps) * g2_ref[0] + be2_ref[0]

    o_ref[...] = src.reshape(bb, S, D).astype(o_ref.dtype)


def _pick_block_b(B, S, D, dff, nhead, budget_bytes=20 * 1024 * 1024):
    """Largest divisor of B whose per-grid-step activation footprint fits budget."""
    def footprint(bb):
        R = bb * S
        f32 = 4
        scores = 3 * nhead * bb * S * S * f32          # scores / exp / attn
        acts = 6 * R * D * f32                         # q, k, v, ctx, src, src2
        ffn = 2 * R * dff * f32                        # h1 (+ bf16 copy)
        io = 2 * 2 * bb * S * D * f32                  # x, pos (double-buffered)
        return scores + acts + ffn + io
    best = 1
    for bb in range(1, B + 1):
        if B % bb == 0 and footprint(bb) <= budget_bytes:
            best = bb
    return best


def transformer_encoder_layer_bsd(x_bsd, pos_bsd, params, *, nhead, eps=1e-5,
                                  block_b=None):
    """Batch-major entry point: x_bsd, pos_bsd are (B, S, D). No extra transposes."""
    B, S, D = x_bsd.shape
    dff = params["w1_t"].shape[1]
    bf16 = jnp.bfloat16

    if block_b is None:
        block_b = _pick_block_b(B, S, D, dff, nhead)
    assert B % block_b == 0, "block_b must divide B"
    bb = block_b

    # Weight matrices in bf16 (MXU-native); biases / LayerNorm params stay f32.
    wq = params["wq_t"].astype(bf16)
    wk = params["wk_t"].astype(bf16)
    wv = params["wv_t"].astype(bf16)
    wo = params["wo_t"].astype(bf16)
    w1 = params["w1_t"].astype(bf16)
    w2 = params["w2_t"].astype(bf16)

    seq_spec = pl.BlockSpec((bb, S, D), lambda b: (b, 0, 0))
    mat_spec = lambda shape: pl.BlockSpec(shape, lambda b: (0, 0))

    in_specs = [
        seq_spec, seq_spec,                                   # x, pos
        mat_spec((D, D)), mat_spec((1, D)),                   # wq_t, bq
        mat_spec((D, D)), mat_spec((1, D)),                   # wk_t, bk
        mat_spec((D, D)), mat_spec((1, D)),                   # wv_t, bv
        mat_spec((D, D)), mat_spec((1, D)),                   # wo_t, bo
        mat_spec((D, dff)), mat_spec((1, dff)),               # w1_t, b1
        mat_spec((dff, D)), mat_spec((1, D)),                 # w2_t, b2
        mat_spec((1, D)), mat_spec((1, D)),                   # gamma1, beta1
        mat_spec((1, D)), mat_spec((1, D)),                   # gamma2, beta2
    ]

    kernel = functools.partial(_encoder_layer_kernel, nhead=nhead, eps=eps)

    # Advisory cost estimate for XLA's scheduler.
    flops = int(B * S * (8 * D * D + 4 * S * D + 4 * D * dff))
    transcendentals = int(B * nhead * S * S)
    bytes_accessed = int(3 * B * S * D * 4
                         + (4 * D * D + 2 * D * dff) * 2
                         + (8 * D + 2 * dff) * 4)

    return pl.pallas_call(
        kernel,
        out_shape=jax.ShapeDtypeStruct((B, S, D), x_bsd.dtype),
        grid_spec=pltpu.PrefetchScalarGridSpec(
            num_scalar_prefetch=0,
            grid=(B // bb,),
            in_specs=in_specs,
            out_specs=pl.BlockSpec((bb, S, D), lambda b: (b, 0, 0)),
        ),
        compiler_params=pltpu.CompilerParams(
            dimension_semantics=("parallel",),
            vmem_limit_bytes=48 * 1024 * 1024,
        ),
        cost_estimate=pl.CostEstimate(flops=flops,
                                      transcendentals=transcendentals,
                                      bytes_accessed=bytes_accessed),
    )(
        x_bsd, pos_bsd,
        wq, params["bq"], wk, params["bk"], wv, params["bv"],
        wo, params["bo"], w1, params["b1"], w2, params["b2"],
        params["gamma1"], params["beta1"], params["gamma2"], params["beta2"],
    )


def transformer_encoder_layer(src_sbd, pos_sbd, params, *, nhead, eps=1e-5):
    """PyTorch nn.MultiheadAttention layout adapter: (S, B, D) in, (S, B, D) out."""
    x = jnp.transpose(src_sbd, (1, 0, 2))     # (B, S, D)
    p = jnp.transpose(pos_sbd, (1, 0, 2))
    out = transformer_encoder_layer_bsd(x, p, params, nhead=nhead, eps=eps)
    return jnp.transpose(out, (1, 0, 2))      # back to (S, B, D)


def make_params(key, d_model, nhead, dim_feedforward):
    ks = jax.random.split(key, 10)
    scale = 0.05
    # nn.MultiheadAttention in_proj_weight is (3D, D); split into q/k/v, store transposed.
    in_proj_w = jax.random.normal(ks[0], (3 * d_model, d_model), jnp.float32) * scale
    in_proj_b = jax.random.normal(ks[1], (3 * d_model,), jnp.float32) * scale
    wq, wk, wv = jnp.split(in_proj_w, 3, axis=0)
    bq, bk, bv = jnp.split(in_proj_b, 3, axis=0)
    wo = jax.random.normal(ks[2], (d_model, d_model), jnp.float32) * scale
    bo = jax.random.normal(ks[3], (d_model,), jnp.float32) * scale
    w1 = jax.random.normal(ks[4], (dim_feedforward, d_model), jnp.float32) * scale
    b1 = jax.random.normal(ks[5], (dim_feedforward,), jnp.float32) * scale
    w2 = jax.random.normal(ks[6], (d_model, dim_feedforward), jnp.float32) * scale
    b2 = jax.random.normal(ks[7], (d_model,), jnp.float32) * scale
    return {
        "wq_t": wq.T, "bq": bq.reshape(1, -1),
        "wk_t": wk.T, "bk": bk.reshape(1, -1),
        "wv_t": wv.T, "bv": bv.reshape(1, -1),
        "wo_t": wo.T, "bo": bo.reshape(1, -1),
        "w1_t": w1.T, "b1": b1.reshape(1, -1),
        "w2_t": w2.T, "b2": b2.reshape(1, -1),
        "gamma1": jnp.ones((1, d_model), jnp.float32),
        "beta1": jnp.zeros((1, d_model), jnp.float32),
        "gamma2": jnp.ones((1, d_model), jnp.float32),
        "beta2": jnp.zeros((1, d_model), jnp.float32),
    }


def _reference(src, pos, params, nhead, eps=1e-5):
    # pure-JAX f32 reference of forward_post (eval mode)
    def ln(x, g, b):
        mu = x.mean(-1, keepdims=True)
        var = ((x - mu) ** 2).mean(-1, keepdims=True)
        return (x - mu) / jnp.sqrt(var + eps) * g + b

    S, B, D = src.shape
    hd = D // nhead
    qk = src + pos
    q = qk @ params["wq_t"] + params["bq"]
    k = qk @ params["wk_t"] + params["bk"]
    v = src @ params["wv_t"] + params["bv"]

    def heads(t):  # (S,B,D) -> (B,H,S,hd)
        return t.reshape(S, B, nhead, hd).transpose(1, 2, 0, 3)

    qh, kh, vh = heads(q), heads(k), heads(v)
    scores = jnp.einsum("bhsd,bhtd->bhst", qh, kh) / jnp.sqrt(hd)
    attn = jax.nn.softmax(scores, axis=-1)
    o = jnp.einsum("bhst,bhtd->bhsd", attn, vh)          # (B,H,S,hd)
    o = o.transpose(2, 0, 1, 3).reshape(S, B, D)
    src2 = o @ params["wo_t"] + params["bo"]
    x = ln(src + src2, params["gamma1"], params["beta1"])
    h = jnp.maximum(x @ params["w1_t"] + params["b1"], 0.0)
    x2 = h @ params["w2_t"] + params["b2"]
    return ln(x + x2, params["gamma2"], params["beta2"])


if __name__ == "__main__":
    # Small shapes: seq=8, batch=2, d_model=32, nhead=4, dim_feedforward=64
    S, B, D, H, DFF = 8, 2, 32, 4, 64
    key = jax.random.PRNGKey(0)
    k_src, k_pos, k_par = jax.random.split(key, 3)
    src = jax.random.normal(k_src, (S, B, D), jnp.float32)
    pos = jax.random.normal(k_pos, (S, B, D), jnp.float32)
    params = make_params(k_par, D, H, DFF)

    out = transformer_encoder_layer(src, pos, params, nhead=H)
    out = jax.block_until_ready(out)

    ref = _reference(src, pos, params, H)
    assert out.shape == (S, B, D)
    # bf16 MXU operands + approx reciprocal -> looser tolerance than pure f32.
    assert jnp.allclose(out, ref, atol=2e-2, rtol=2e-2), "mismatch vs reference"
    print("KERNEL_OK")
</pallas_src>

<mosaic_0001>
module attributes {stable_mosaic.version = 11 : i64} {
  func.func @_encoder_layer_kernel(%arg0: i32, %arg1: memref<2x8x32xf32, #tpu.memory_space<vmem>>, %arg2: memref<2x8x32xf32, #tpu.memory_space<vmem>>, %arg3: memref<32x32xbf16, #tpu.memory_space<vmem>>, %arg4: memref<1x32xf32, #tpu.memory_space<vmem>>, %arg5: memref<32x32xbf16, #tpu.memory_space<vmem>>, %arg6: memref<1x32xf32, #tpu.memory_space<vmem>>, %arg7: memref<32x32xbf16, #tpu.memory_space<vmem>>, %arg8: memref<1x32xf32, #tpu.memory_space<vmem>>, %arg9: memref<32x32xbf16, #tpu.memory_space<vmem>>, %arg10: memref<1x32xf32, #tpu.memory_space<vmem>>, %arg11: memref<32x64xbf16, #tpu.memory_space<vmem>>, %arg12: memref<1x64xf32, #tpu.memory_space<vmem>>, %arg13: memref<64x32xbf16, #tpu.memory_space<vmem>>, %arg14: memref<1x32xf32, #tpu.memory_space<vmem>>, %arg15: memref<1x32xf32, #tpu.memory_space<vmem>>, %arg16: memref<1x32xf32, #tpu.memory_space<vmem>>, %arg17: memref<1x32xf32, #tpu.memory_space<vmem>>, %arg18: memref<1x32xf32, #tpu.memory_space<vmem>>, %arg19: memref<2x8x32xf32, #tpu.memory_space<vmem>>) attributes {dimension_semantics = [#tpu.dimension_semantics<parallel>], iteration_bounds = array<i64: 1>, scalar_prefetch = 0 : i64, scratch_operands = 0 : i64, tpu.core_type = #tpu.core_type<tc>, window_params = [{transform_indices = @transform_0, window_bounds = array<i64: 2, 8, 32>}, {transform_indices = @transform_1, window_bounds = array<i64: 2, 8, 32>}, {pipeline_mode = #tpu.pipeline_mode<synchronous>, transform_indices = @transform_2, window_bounds = array<i64: 32, 32>}, {pipeline_mode = #tpu.pipeline_mode<synchronous>, transform_indices = @transform_3, window_bounds = array<i64: 1, 32>}, {pipeline_mode = #tpu.pipeline_mode<synchronous>, transform_indices = @transform_4, window_bounds = array<i64: 32, 32>}, {pipeline_mode = #tpu.pipeline_mode<synchronous>, transform_indices = @transform_5, window_bounds = array<i64: 1, 32>}, {pipeline_mode = #tpu.pipeline_mode<synchronous>, transform_indices = @transform_6, window_bounds = array<i64: 32, 32>}, {pipeline_mode = #tpu.pipeline_mode<synchronous>, transform_indices = @transform_7, window_bounds = array<i64: 1, 32>}, {pipeline_mode = #tpu.pipeline_mode<synchronous>, transform_indices = @transform_8, window_bounds = array<i64: 32, 32>}, {pipeline_mode = #tpu.pipeline_mode<synchronous>, transform_indices = @transform_9, window_bounds = array<i64: 1, 32>}, {pipeline_mode = #tpu.pipeline_mode<synchronous>, transform_indices = @transform_10, window_bounds = array<i64: 32, 64>}, {pipeline_mode = #tpu.pipeline_mode<synchronous>, transform_indices = @transform_11, window_bounds = array<i64: 1, 64>}, {pipeline_mode = #tpu.pipeline_mode<synchronous>, transform_indices = @transform_12, window_bounds = array<i64: 64, 32>}, {pipeline_mode = #tpu.pipeline_mode<synchronous>, transform_indices = @transform_13, window_bounds = array<i64: 1, 32>}, {pipeline_mode = #tpu.pipeline_mode<synchronous>, transform_indices = @transform_14, window_bounds = array<i64: 1, 32>}, {pipeline_mode = #tpu.pipeline_mode<synchronous>, transform_indices = @transform_15, window_bounds = array<i64: 1, 32>}, {pipeline_mode = #tpu.pipeline_mode<synchronous>, transform_indices = @transform_16, window_bounds = array<i64: 1, 32>}, {pipeline_mode = #tpu.pipeline_mode<synchronous>, transform_indices = @transform_17, window_bounds = array<i64: 1, 32>}, {transform_indices = @transform_18, window_bounds = array<i64: 2, 8, 32>}]} {
    %cst = arith.constant 8.000000e+00 : f32
    %0 = math.sqrt %cst : f32
    %cst_0 = arith.constant 1.000000e+00 : f32
    %1 = arith.divf %cst_0, %0 : f32
    %c0 = arith.constant 0 : index
    %c0_1 = arith.constant 0 : index
    %c0_2 = arith.constant 0 : index
    %2 = vector.load %arg1[%c0, %c0_1, %c0_2] : memref<2x8x32xf32, #tpu.memory_space<vmem>>, vector<2x8x32xf32>
    %3 = vector.shape_cast %2 : vector<2x8x32xf32> to vector<16x32xf32>
    %c0_3 = arith.constant 0 : index
    %c0_4 = arith.constant 0 : index
    %c0_5 = arith.constant 0 : index
    %4 = vector.load %arg2[%c0_3, %c0_4, %c0_5] : memref<2x8x32xf32, #tpu.memory_space<vmem>>, vector<2x8x32xf32>
    %5 = vector.shape_cast %4 : vector<2x8x32xf32> to vector<16x32xf32>
    %6 = arith.addf %3, %5 : vector<16x32xf32>
    %7 = arith.truncf %6 : vector<16x32xf32> to vector<16x32xbf16>
    %8 = arith.truncf %3 : vector<16x32xf32> to vector<16x32xbf16>
    %c0_6 = arith.constant 0 : index
    %c0_7 = arith.constant 0 : index
    %9 = vector.load %arg3[%c0_6, %c0_7] : memref<32x32xbf16, #tpu.memory_space<vmem>>, vector<32x32xbf16>
    %cst_8 = arith.constant dense<0.000000e+00> : vector<16x32xf32>
    %10 = tpu.matmul %7, %9, %cst_8 {dimension_numbers = #tpu.dot_dimension_numbers<[1], [0], [0], [1], [0, 0, 1, 1], [], []>} : vector<16x32xbf16>, vector<32x32xbf16>, vector<16x32xf32> -> vector<16x32xf32>
    %c0_9 = arith.constant 0 : index
    %c0_10 = arith.constant 0 : index
    %11 = vector.load %arg4[%c0_9, %c0_10] : memref<1x32xf32, #tpu.memory_space<vmem>>, vector<1x32xf32>
    %12 = vector.shape_cast %11 : vector<1x32xf32> to vector<32xf32>
    %13 = vector.shape_cast %12 : vector<32xf32> to vector<1x32xf32>
    %14 = vector.broadcast %13 : vector<1x32xf32> to vector<16x32xf32>
    %15 = arith.addf %10, %14 : vector<16x32xf32>
    %c0_11 = arith.constant 0 : index
    %c0_12 = arith.constant 0 : index
    %16 = vector.load %arg5[%c0_11, %c0_12] : memref<32x32xbf16, #tpu.memory_space<vmem>>, vector<32x32xbf16>
    %cst_13 = arith.constant dense<0.000000e+00> : vector<16x32xf32>
    %17 = tpu.matmul %7, %16, %cst_13 {dimension_numbers = #tpu.dot_dimension_numbers<[1], [0], [0], [1], [0, 0, 1, 1], [], []>} : vector<16x32xbf16>, vector<32x32xbf16>, vector<16x32xf32> -> vector<16x32xf32>
    %c0_14 = arith.constant 0 : index
    %c0_15 = arith.constant 0 : index
    %18 = vector.load %arg6[%c0_14, %c0_15] : memref<1x32xf32, #tpu.memory_space<vmem>>, vector<1x32xf32>
    %19 = vector.shape_cast %18 : vector<1x32xf32> to vector<32xf32>
    %20 = vector.shape_cast %19 : vector<32xf32> to vector<1x32xf32>
    %21 = vector.broadcast %20 : vector<1x32xf32> to vector<16x32xf32>
    %22 = arith.addf %17, %21 : vector<16x32xf32>
    %c0_16 = arith.constant 0 : index
    %c0_17 = arith.constant 0 : index
    %23 = vector.load %arg7[%c0_16, %c0_17] : memref<32x32xbf16, #tpu.memory_space<vmem>>, vector<32x32xbf16>
    %cst_18 = arith.constant dense<0.000000e+00> : vector<16x32xf32>
    %24 = tpu.matmul %8, %23, %cst_18 {dimension_numbers = #tpu.dot_dimension_numbers<[1], [0], [0], [1], [0, 0, 1, 1], [], []>} : vector<16x32xbf16>, vector<32x32xbf16>, vector<16x32xf32> -> vector<16x32xf32>
    %c0_19 = arith.constant 0 : index
    %c0_20 = arith.constant 0 : index
    %25 = vector.load %arg8[%c0_19, %c0_20] : memref<1x32xf32, #tpu.memory_space<vmem>>, vector<1x32xf32>
    %26 = vector.shape_cast %25 : vector<1x32xf32> to vector<32xf32>
    %27 = vector.shape_cast %26 : vector<32xf32> to vector<1x32xf32>
    %28 = vector.broadcast %27 : vector<1x32xf32> to vector<16x32xf32>
    %29 = arith.addf %24, %28 : vector<16x32xf32>
    %30 = arith.truncf %15 : vector<16x32xf32> to vector<16x32xbf16>
    %31 = vector.shape_cast %30 : vector<16x32xbf16> to vector<16x4x8xbf16>
    %32 = tpu.transpose %31, [1, 0, 2] : vector<16x4x8xbf16> -> vector<4x16x8xbf16>
    %33 = vector.shape_cast %32 : vector<4x16x8xbf16> to vector<8x8x8xbf16>
    %34 = arith.truncf %22 : vector<16x32xf32> to vector<16x32xbf16>
    %35 = vector.shape_cast %34 : vector<16x32xbf16> to vector<16x4x8xbf16>
    %36 = tpu.transpose %35, [1, 0, 2] : vector<16x4x8xbf16> -> vector<4x16x8xbf16>
    %37 = vector.shape_cast %36 : vector<4x16x8xbf16> to vector<8x8x8xbf16>
    %38 = arith.truncf %29 : vector<16x32xf32> to vector<16x32xbf16>
    %39 = vector.shape_cast %38 : vector<16x32xbf16> to vector<16x4x8xbf16>
    %40 = tpu.transpose %39, [1, 0, 2] : vector<16x4x8xbf16> -> vector<4x16x8xbf16>
    %41 = vector.shape_cast %40 : vector<4x16x8xbf16> to vector<8x8x8xbf16>
    "tpu.trace_start"() <{level = 10 : i32, message = "gqd,gkd->gqk"}> : () -> ()
    %cst_21 = arith.constant dense<0.000000e+00> : vector<8x8x8xf32>
    %42 = tpu.matmul %33, %37, %cst_21 {dimension_numbers = #tpu.dot_dimension_numbers<[2], [2], [1], [1], [0, 0, 0, 1, 1, 1], [0], [0]>} : vector<8x8x8xbf16>, vector<8x8x8xbf16>, vector<8x8x8xf32> -> vector<8x8x8xf32>
    "tpu.trace_stop"() : () -> ()
    %43 = vector.broadcast %1 : f32 to vector<8x8x8xf32>
    %44 = arith.mulf %42, %43 : vector<8x8x8xf32>
    %cst_22 = arith.constant dense<0xFF800000> : vector<8x8xf32>
    %45 = vector.multi_reduction <maximumf>, %44, %cst_22 [2] : vector<8x8x8xf32> to vector<8x8xf32>
    %46 = vector.shape_cast %45 : vector<8x8xf32> to vector<8x8x1xf32>
    %47 = vector.broadcast %46 : vector<8x8x1xf32> to vector<8x8x8xf32>
    %48 = arith.subf %44, %47 : vector<8x8x8xf32>
    %49 = math.exp %48 : vector<8x8x8xf32>
    %cst_23 = arith.constant dense<0.000000e+00> : vector<8x8xf32>
    %50 = vector.multi_reduction <add>, %49, %cst_23 [2] : vector<8x8x8xf32> to vector<8x8xf32>
    %51 = vector.shape_cast %50 : vector<8x8xf32> to vector<8x8x1xf32>
    %52 = tpu.reciprocal %51 {approx = true} : vector<8x8x1xf32> -> vector<8x8x1xf32>
    %53 = vector.broadcast %52 : vector<8x8x1xf32> to vector<8x8x8xf32>
    %54 = arith.mulf %49, %53 : vector<8x8x8xf32>
    %55 = arith.truncf %54 : vector<8x8x8xf32> to vector<8x8x8xbf16>
    "tpu.trace_start"() <{level = 10 : i32, message = "gqk,gkd->gqd"}> : () -> ()
    %cst_24 = arith.constant dense<0.000000e+00> : vector<8x8x8xf32>
    %56 = tpu.matmul %55, %41, %cst_24 {dimension_numbers = #tpu.dot_dimension_numbers<[2], [1], [1], [2], [0, 0, 0, 1, 1, 2], [0], [0]>} : vector<8x8x8xbf16>, vector<8x8x8xbf16>, vector<8x8x8xf32> -> vector<8x8x8xf32>
    "tpu.trace_stop"() : () -> ()
    %57 = vector.shape_cast %56 : vector<8x8x8xf32> to vector<4x16x8xf32>
    %58 = tpu.transpose %57, [1, 0, 2] : vector<4x16x8xf32> -> vector<16x4x8xf32>
    %59 = vector.shape_cast %58 : vector<16x4x8xf32> to vector<16x32xf32>
    %60 = arith.truncf %59 : vector<16x32xf32> to vector<16x32xbf16>
    %c0_25 = arith.constant 0 : index
    %c0_26 = arith.constant 0 : index
    %61 = vector.load %arg9[%c0_25, %c0_26] : memref<32x32xbf16, #tpu.memory_space<vmem>>, vector<32x32xbf16>
    %cst_27 = arith.constant dense<0.000000e+00> : vector<16x32xf32>
    %62 = tpu.matmul %60, %61, %cst_27 {dimension_numbers = #tpu.dot_dimension_numbers<[1], [0], [0], [1], [0, 0, 1, 1], [], []>} : vector<16x32xbf16>, vector<32x32xbf16>, vector<16x32xf32> -> vector<16x32xf32>
    %c0_28 = arith.constant 0 : index
    %c0_29 = arith.constant 0 : index
    %63 = vector.load %arg10[%c0_28, %c0_29] : memref<1x32xf32, #tpu.memory_space<vmem>>, vector<1x32xf32>
    %64 = vector.shape_cast %63 : vector<1x32xf32> to vector<32xf32>
    %65 = vector.shape_cast %64 : vector<32xf32> to vector<1x32xf32>
    %66 = vector.broadcast %65 : vector<1x32xf32> to vector<16x32xf32>
    %67 = arith.addf %62, %66 : vector<16x32xf32>
    %68 = arith.addf %3, %67 : vector<16x32xf32>
    %cst_30 = arith.constant dense<0.000000e+00> : vector<16xf32>
    %69 = vector.multi_reduction <add>, %68, %cst_30 [1] : vector<16x32xf32> to vector<16xf32>
    %70 = vector.shape_cast %69 : vector<16xf32> to vector<16x1xf32>
    %cst_31 = arith.constant 3.200000e+01 : f32
    %71 = vector.broadcast %cst_31 : f32 to vector<16x1xf32>
    %72 = arith.divf %70, %71 : vector<16x1xf32>
    %73 = vector.broadcast %72 : vector<16x1xf32> to vector<16x32xf32>
    %74 = arith.subf %68, %73 : vector<16x32xf32>
    %75 = arith.mulf %74, %74 : vector<16x32xf32>
    %cst_32 = arith.constant dense<0.000000e+00> : vector<16xf32>
    %76 = vector.multi_reduction <add>, %75, %cst_32 [1] : vector<16x32xf32> to vector<16xf32>
    %77 = vector.shape_cast %76 : vector<16xf32> to vector<16x1xf32>
    %cst_33 = arith.constant 3.200000e+01 : f32
    %78 = vector.broadcast %cst_33 : f32 to vector<16x1xf32>
    %79 = arith.divf %77, %78 : vector<16x1xf32>
    %80 = vector.broadcast %72 : vector<16x1xf32> to vector<16x32xf32>
    %81 = arith.subf %68, %80 : vector<16x32xf32>
    %cst_34 = arith.constant 9.99999974E-6 : f32
    %82 = vector.broadcast %cst_34 : f32 to vector<16x1xf32>
    %83 = arith.addf %79, %82 : vector<16x1xf32>
    %84 = math.rsqrt %83 : vector<16x1xf32>
    %85 = vector.broadcast %84 : vector<16x1xf32> to vector<16x32xf32>
    %86 = arith.mulf %81, %85 : vector<16x32xf32>
    %c0_35 = arith.constant 0 : index
    %c0_36 = arith.constant 0 : index
    %87 = vector.load %arg15[%c0_35, %c0_36] : memref<1x32xf32, #tpu.memory_space<vmem>>, vector<1x32xf32>
    %88 = vector.shape_cast %87 : vector<1x32xf32> to vector<32xf32>
    %89 = vector.shape_cast %88 : vector<32xf32> to vector<1x32xf32>
    %90 = vector.broadcast %89 : vector<1x32xf32> to vector<16x32xf32>
    %91 = arith.mulf %86, %90 : vector<16x32xf32>
    %c0_37 = arith.constant 0 : index
    %c0_38 = arith.constant 0 : index
    %92 = vector.load %arg16[%c0_37, %c0_38] : memref<1x32xf32, #tpu.memory_space<vmem>>, vector<1x32xf32>
    %93 = vector.shape_cast %92 : vector<1x32xf32> to vector<32xf32>
    %94 = vector.shape_cast %93 : vector<32xf32> to vector<1x32xf32>
    %95 = vector.broadcast %94 : vector<1x32xf32> to vector<16x32xf32>
    %96 = arith.addf %91, %95 : vector<16x32xf32>
    %97 = arith.truncf %96 : vector<16x32xf32> to vector<16x32xbf16>
    %c0_39 = arith.constant 0 : index
    %c0_40 = arith.constant 0 : index
    %98 = vector.load %arg11[%c0_39, %c0_40] : memref<32x64xbf16, #tpu.memory_space<vmem>>, vector<32x64xbf16>
    %cst_41 = arith.constant dense<0.000000e+00> : vector<16x64xf32>
    %99 = tpu.matmul %97, %98, %cst_41 {dimension_numbers = #tpu.dot_dimension_numbers<[1], [0], [0], [1], [0, 0, 1, 1], [], []>} : vector<16x32xbf16>, vector<32x64xbf16>, vector<16x64xf32> -> vector<16x64xf32>
    %c0_42 = arith.constant 0 : index
    %c0_43 = arith.constant 0 : index
    %100 = vector.load %arg12[%c0_42, %c0_43] : memref<1x64xf32, #tpu.memory_space<vmem>>, vector<1x64xf32>
    %101 = vector.shape_cast %100 : vector<1x64xf32> to vector<64xf32>
    %102 = vector.shape_cast %101 : vector<64xf32> to vector<1x64xf32>
    %103 = vector.broadcast %102 : vector<1x64xf32> to vector<16x64xf32>
    %104 = arith.addf %99, %103 : vector<16x64xf32>
    %cst_44 = arith.constant 0.000000e+00 : f32
    %105 = vector.broadcast %cst_44 : f32 to vector<16x64xf32>
    %106 = arith.maximumf %104, %105 : vector<16x64xf32>
    %107 = arith.truncf %106 : vector<16x64xf32> to vector<16x64xbf16>
    %c0_45 = arith.constant 0 : index
    %c0_46 = arith.constant 0 : index
    %108 = vector.load %arg13[%c0_45, %c0_46] : memref<64x32xbf16, #tpu.memory_space<vmem>>, vector<64x32xbf16>
    %cst_47 = arith.constant dense<0.000000e+00> : vector<16x32xf32>
    %109 = tpu.matmul %107, %108, %cst_47 {dimension_numbers = #tpu.dot_dimension_numbers<[1], [0], [0], [1], [0, 0, 1, 1], [], []>} : vector<16x64xbf16>, vector<64x32xbf16>, vector<16x32xf32> -> vector<16x32xf32>
    %c0_48 = arith.constant 0 : index
    %c0_49 = arith.constant 0 : index
    %110 = vector.load %arg14[%c0_48, %c0_49] : memref<1x32xf32, #tpu.memory_space<vmem>>, vector<1x32xf32>
    %111 = vector.shape_cast %110 : vector<1x32xf32> to vector<32xf32>
    %112 = vector.shape_cast %111 : vector<32xf32> to vector<1x32xf32>
    %113 = vector.broadcast %112 : vector<1x32xf32> to vector<16x32xf32>
    %114 = arith.addf %109, %113 : vector<16x32xf32>
    %115 = arith.addf %96, %114 : vector<16x32xf32>
    %cst_50 = arith.constant dense<0.000000e+00> : vector<16xf32>
    %116 = vector.multi_reduction <add>, %115, %cst_50 [1] : vector<16x32xf32> to vector<16xf32>
    %117 = vector.shape_cast %116 : vector<16xf32> to vector<16x1xf32>
    %cst_51 = arith.constant 3.200000e+01 : f32
    %118 = vector.broadcast %cst_51 : f32 to vector<16x1xf32>
    %119 = arith.divf %117, %118 : vector<16x1xf32>
    %120 = vector.broadcast %119 : vector<16x1xf32> to vector<16x32xf32>
    %121 = arith.subf %115, %120 : vector<16x32xf32>
    %122 = arith.mulf %121, %121 : vector<16x32xf32>
    %cst_52 = arith.constant dense<0.000000e+00> : vector<16xf32>
    %123 = vector.multi_reduction <add>, %122, %cst_52 [1] : vector<16x32xf32> to vector<16xf32>
    %124 = vector.shape_cast %123 : vector<16xf32> to vector<16x1xf32>
    %cst_53 = arith.constant 3.200000e+01 : f32
    %125 = vector.broadcast %cst_53 : f32 to vector<16x1xf32>
    %126 = arith.divf %124, %125 : vector<16x1xf32>
    %127 = vector.broadcast %119 : vector<16x1xf32> to vector<16x32xf32>
    %128 = arith.subf %115, %127 : vector<16x32xf32>
    %cst_54 = arith.constant 9.99999974E-6 : f32
    %129 = vector.broadcast %cst_54 : f32 to vector<16x1xf32>
    %130 = arith.addf %126, %129 : vector<16x1xf32>
    %131 = math.rsqrt %130 : vector<16x1xf32>
    %132 = vector.broadcast %131 : vector<16x1xf32> to vector<16x32xf32>
    %133 = arith.mulf %128, %132 : vector<16x32xf32>
    %c0_55 = arith.constant 0 : index
    %c0_56 = arith.constant 0 : index
    %134 = vector.load %arg17[%c0_55, %c0_56] : memref<1x32xf32, #tpu.memory_space<vmem>>, vector<1x32xf32>
    %135 = vector.shape_cast %134 : vector<1x32xf32> to vector<32xf32>
    %136 = vector.shape_cast %135 : vector<32xf32> to vector<1x32xf32>
    %137 = vector.broadcast %136 : vector<1x32xf32> to vector<16x32xf32>
    %138 = arith.mulf %133, %137 : vector<16x32xf32>
    %c0_57 = arith.constant 0 : index
    %c0_58 = arith.constant 0 : index
    %139 = vector.load %arg18[%c0_57, %c0_58] : memref<1x32xf32, #tpu.memory_space<vmem>>, vector<1x32xf32>
    %140 = vector.shape_cast %139 : vector<1x32xf32> to vector<32xf32>
    %141 = vector.shape_cast %140 : vector<32xf32> to vector<1x32xf32>
    %142 = vector.broadcast %141 : vector<1x32xf32> to vector<16x32xf32>
    %143 = arith.addf %138, %142 : vector<16x32xf32>
    %144 = vector.shape_cast %143 : vector<16x32xf32> to vector<2x8x32xf32>
    %c0_59 = arith.constant 0 : index
    %c0_60 = arith.constant 0 : index
    %c0_61 = arith.constant 0 : index
    %145 = vector.load %arg19[%c0_59, %c0_60, %c0_61] : memref<2x8x32xf32, #tpu.memory_space<vmem>>, vector<2x8x32xf32>
    tpu.vector_store %arg19[%c0_59, %c0_60, %c0_61], %144 {strides = array<i32>} : memref<2x8x32xf32, #tpu.memory_space<vmem>>, vector<2x8x32xf32>,
    return
  }
  func.func @transform_0(%arg0: i32) -> (i32, i32, i32) {
    %c0_i32 = arith.constant 0 : i32
    %c0_i32_0 = arith.constant 0 : i32
    %c0_i32_1 = arith.constant 0 : i32
    return %arg0, %c0_i32, %c0_i32_0 : i32, i32, i32
  }
  func.func @transform_1(%arg0: i32) -> (i32, i32, i32) {
    %c0_i32 = arith.constant 0 : i32
    %c0_i32_0 = arith.constant 0 : i32
    %c0_i32_1 = arith.constant 0 : i32
    return %arg0, %c0_i32, %c0_i32_0 : i32, i32, i32
  }
  func.func @transform_2(%arg0: i32) -> (i32, i32) {
    %c0_i32 = arith.constant 0 : i32
    %c0_i32_0 = arith.constant 0 : i32
    %c0_i32_1 = arith.constant 0 : i32
    return %c0_i32, %c0_i32_0 : i32, i32
  }
  func.func @transform_3(%arg0: i32) -> (i32, i32) {
    %c0_i32 = arith.constant 0 : i32
    %c0_i32_0 = arith.constant 0 : i32
    %c0_i32_1 = arith.constant 0 : i32
    return %c0_i32, %c0_i32_0 : i32, i32
  }
  func.func @transform_4(%arg0: i32) -> (i32, i32) {
    %c0_i32 = arith.constant 0 : i32
    %c0_i32_0 = arith.constant 0 : i32
    %c0_i32_1 = arith.constant 0 : i32
    return %c0_i32, %c0_i32_0 : i32, i32
  }
  func.func @transform_5(%arg0: i32) -> (i32, i32) {
    %c0_i32 = arith.constant 0 : i32
    %c0_i32_0 = arith.constant 0 : i32
    %c0_i32_1 = arith.constant 0 : i32
    return %c0_i32, %c0_i32_0 : i32, i32
  }
  func.func @transform_6(%arg0: i32) -> (i32, i32) {
    %c0_i32 = arith.constant 0 : i32
    %c0_i32_0 = arith.constant 0 : i32
    %c0_i32_1 = arith.constant 0 : i32
    return %c0_i32, %c0_i32_0 : i32, i32
  }
  func.func @transform_7(%arg0: i32) -> (i32, i32) {
    %c0_i32 = arith.constant 0 : i32
    %c0_i32_0 = arith.constant 0 : i32
    %c0_i32_1 = arith.constant 0 : i32
    return %c0_i32, %c0_i32_0 : i32, i32
  }
  func.func @transform_8(%arg0: i32) -> (i32, i32) {
    %c0_i32 = arith.constant 0 : i32
    %c0_i32_0 = arith.constant 0 : i32
    %c0_i32_1 = arith.constant 0 : i32
    return %c0_i32, %c0_i32_0 : i32, i32
  }
  func.func @transform_9(%arg0: i32) -> (i32, i32) {
    %c0_i32 = arith.constant 0 : i32
    %c0_i32_0 = arith.constant 0 : i32
    %c0_i32_1 = arith.constant 0 : i32
    return %c0_i32, %c0_i32_0 : i32, i32
  }
  func.func @transform_10(%arg0: i32) -> (i32, i32) {
    %c0_i32 = arith.constant 0 : i32
    %c0_i32_0 = arith.constant 0 : i32
    %c0_i32_1 = arith.constant 0 : i32
    return %c0_i32, %c0_i32_0 : i32, i32
  }
  func.func @transform_11(%arg0: i32) -> (i32, i32) {
    %c0_i32 = arith.constant 0 : i32
    %c0_i32_0 = arith.constant 0 : i32
    %c0_i32_1 = arith.constant 0 : i32
    return %c0_i32, %c0_i32_0 : i32, i32
  }
  func.func @transform_12(%arg0: i32) -> (i32, i32) {
    %c0_i32 = arith.constant 0 : i32
    %c0_i32_0 = arith.constant 0 : i32
    %c0_i32_1 = arith.constant 0 : i32
    return %c0_i32, %c0_i32_0 : i32, i32
  }
  func.func @transform_13(%arg0: i32) -> (i32, i32) {
    %c0_i32 = arith.constant 0 : i32
    %c0_i32_0 = arith.constant 0 : i32
    %c0_i32_1 = arith.constant 0 : i32
    return %c0_i32, %c0_i32_0 : i32, i32
  }
  func.func @transform_14(%arg0: i32) -> (i32, i32) {
    %c0_i32 = arith.constant 0 : i32
    %c0_i32_0 = arith.constant 0 : i32
    %c0_i32_1 = arith.constant 0 : i32
    return %c0_i32, %c0_i32_0 : i32, i32
  }
  func.func @transform_15(%arg0: i32) -> (i32, i32) {
    %c0_i32 = arith.constant 0 : i32
    %c0_i32_0 = arith.constant 0 : i32
    %c0_i32_1 = arith.constant 0 : i32
    return %c0_i32, %c0_i32_0 : i32, i32
  }
  func.func @transform_16(%arg0: i32) -> (i32, i32) {
    %c0_i32 = arith.constant 0 : i32
    %c0_i32_0 = arith.constant 0 : i32
    %c0_i32_1 = arith.constant 0 : i32
    return %c0_i32, %c0_i32_0 : i32, i32
  }
  func.func @transform_17(%arg0: i32) -> (i32, i32) {
    %c0_i32 = arith.constant 0 : i32
    %c0_i32_0 = arith.constant 0 : i32
    %c0_i32_1 = arith.constant 0 : i32
    return %c0_i32, %c0_i32_0 : i32, i32
  }
  func.func @transform_18(%arg0: i32) -> (i32, i32, i32) {
    %c0_i32 = arith.constant 0 : i32
    %c0_i32_0 = arith.constant 0 : i32
    %c0_i32_1 = arith.constant 0 : i32
    return %arg0, %c0_i32, %c0_i32_0 : i32, i32, i32
  }
}

</mosaic_0001>

<bundles_post_ra>
// kernel: tpu_custom_call.1
= control target key start
LH: loop header
LB: loop body
LE: loop exit
PB: predicated region body
PF: predicated region fallthrough
CT: control target
= control target key end

     0   :  { %s2938_s0 = inlined_call_operand.vmem [shape: f32[2,8,32], index: 0, kind: input, shape index: {}]   ;;  %s2939_s1 = inlined_call_operand.vmem [shape: f32[2,8,32], index: 1, kind: input, shape index: {}]   ;;  %s2940_s2 = inlined_call_operand.vmem [shape: bf16[32,32], index: 2, kind: input, shape index: {}]   ;;  %s2941_s3 = inlined_call_operand.vmem [shape: f32[1,32], index: 3, kind: input, shape index: {}]   ;;  %s2942_s4 = inlined_call_operand.hbm [shape: bf16[32,32], index: 4, kind: input, shape index: {}]   ;;  %s2943_s5 = inlined_call_operand.vmem [shape: f32[1,32], index: 5, kind: input, shape index: {}]   ;;  %s2944_s6 = inlined_call_operand.hbm [shape: bf16[32,32], index: 6, kind: input, shape index: {}]   ;;  %s2945_s7 = inlined_call_operand.vmem [shape: f32[1,32], index: 7, kind: input, shape index: {}]   ;;  %s2946_s8 = inlined_call_operand.hbm [shape: bf16[32,32], index: 8, kind: input, shape index: {}]   ;;  %s2947_s9 = inlined_call_operand.vmem [shape: f32[1,32], index: 9, kind: input, shape index: {}]   ;;  %s2948_s10 = inlined_call_operand.hbm [shape: bf16[32,64], index: 10, kind: input, shape index: {}]   ;;  %s2949_s11 = inlined_call_operand.vmem [shape: f32[1,64], index: 11, kind: input, shape index: {}]   ;;  %s2950_s12 = inlined_call_operand.vmem [shape: bf16[64,32], index: 12, kind: input, shape index: {}]   ;;  %s2951_s13 = inlined_call_operand.vmem [shape: f32[1,32], index: 13, kind: input, shape index: {}]   ;;  %s2952_s14 = inlined_call_operand.vmem [shape: f32[1,32], index: 14, kind: input, shape index: {}]   ;;  %s2953_s15 = inlined_call_operand.vmem [shape: f32[1,32], index: 15, kind: input, shape index: {}]   ;;  %s2954_s16 = inlined_call_operand.vmem [shape: f32[1,32], index: 16, kind: input, shape index: {}]   ;;  %s2955_s17 = inlined_call_operand.vmem [shape: f32[1,32], index: 17, kind: input, shape index: {}]   ;;  %s2956_s18 = inlined_call_operand.hbm [shape: f32[2,8,32], index: 18, kind: output, shape index: {}]  }
   0x1   :  { %2960 = sst [smem:[#allocation15_spill]] %s2938_s0 }
   0x2   :  { %2961 = sst [smem:[#allocation16_spill]] %s2939_s1 }
   0x3   :  { %2962 = sst [smem:[#allocation17_spill]] %s2940_s2 }
   0x4   :  { %23 = vsyncpa [#allocation3], 0 }
   0x5   :  { %24 = vsyncpa [#allocation6], 0 }
   0x6   :  { %25 = vsyncpa [#allocation9], 0 }
   0x7   :  { %26 = vsyncpa [#allocation4], 0  ;;  %s54_s29 = sshll.u32 %s2944_s6, 4  ;;  %s2222_s30 = smov [#allocation5]   ;;  %s55_s29 = int_to_ptr.hbm [resolvable:$true] %s54_s29 }
   0x8   :  { %s56_s0 = sshll.u32 %s2222_s30, 4  ;;  %s39_s20 = sshll.u32 %s2942_s4, 4  ;;  %s57_s0 = int_to_ptr.vmem [resolvable:$true] %s56_s0  ;;  %s40_s20 = int_to_ptr.hbm [resolvable:$true] %s39_s20 }
   0x9   :  { %s2223_s21 = smov 64   ;;  %s2224_s22 = smov 4  }
   0xa   :  { %62 = dma.hbm_to_vmem [thread:$0]  %s55_s29, 256, %s57_s0, [#allocation6], %s2223_s21, %s2223_s21, %s2224_s22  }
   0xb   :  { %s2225_s2 = smov [#allocation2]   ;;  %s69_s26 = sshll.u32 %s2946_s8, 4  ;;  %s70_s26 = int_to_ptr.hbm [resolvable:$true] %s69_s26 }
   0xc   :  { %s41_s23 = sshll.u32 %s2225_s2, 4  ;;  %s84_s28 = sshll.u32 %s2948_s10, 4  ;;  %s42_s23 = int_to_ptr.vmem [resolvable:$true] %s41_s23  ;;  %s85_s28 = int_to_ptr.hbm [resolvable:$true] %s84_s28 }
   0xd   :  { %47 = dma.hbm_to_vmem [thread:$0]  %s40_s20, 256, %s42_s23, [#allocation3], %s2223_s21, %s2223_s21, %s2224_s22  }
   0xe   :  { %s2226_s30 = smov [#allocation7]   ;;  %s2227_s4 = smov [#allocation8]  }
   0xf   :  { %s71_s19 = sshll.u32 %s2226_s30, 4  ;;  %s86_s29 = sshll.u32 %s2227_s4, 4  ;;  %s72_s19 = int_to_ptr.vmem [resolvable:$true] %s71_s19  ;;  %s87_s29 = int_to_ptr.vmem [resolvable:$true] %s86_s29 }
  0x10   :  { %77 = dma.hbm_to_vmem [thread:$0]  %s70_s26, 256, %s72_s19, [#allocation6], %s2223_s21, %s2223_s21, %s2224_s22  }
  0x11   :  { %92 = dma.hbm_to_vmem [thread:$0]  %s85_s28, 256, %s87_s29, [#allocation9], %s2223_s21, %s2223_s21, %s2224_s22  }
  0x12   :  { %2214 = dma.done.wait [#allocation3], 256  }
  0x13   :  { %2215 = vsyncadd [#allocation3], 4294967040 }
  0x14   :  { %2216 = dma.done.wait [#allocation6], 512  }
  0x15   :  { %2217 = vsyncadd [#allocation6], 4294966784 }
  0x16   :  { %2218 = dma.done.wait [#allocation9], 256  }
  0x17   :  { %2219 = vsyncadd [#allocation9], 4294967040  ;;  %s2963_s1 = sld [smem:[#allocation17_spill]]  ;;  %v1997_v1 = vld [vmem:[#allocation2 + $0x8] sm:$0xff]  ;;  %v1996_v3 = vld [vmem:[#allocation2] sm:$0xff]  ;;  %vm152_vm0 = vcmask 261120  }
  0x18   :  { %s2964_s24 = sld [smem:[#allocation15_spill]]  ;;  %196 = vmatpush.bf16.msra.mxu1 %v1997_v1  ;;  %v1999_v8 = vld [vmem:[#allocation5 + $0x8] sm:$0xff]  ;;  %v1998_v12 = vld [vmem:[#allocation5] sm:$0xff]  ;;  %v2041_v14 = vld [vmem:[%s2943_s5] ss:$0 sm:$0xff]  ;;  %s2228_s8 = smov 104  }
  0x19   :  { %s2965_s6 = sld [smem:[#allocation16_spill]]  ;;  %233 = vmatpush.bf16.msra.mxu2 %v1999_v8  ;;  %v2040_v16 = vld [vmem:[%s2941_s3] ss:$0 sm:$0xff]  ;;  %s2229_s0 = smov 112   ;;  %v2231_v34 = vmov 1983009808  }
  0x1a   :  { %v2403_v29 = vld [vmem:[%s2945_s7] ss:$0 sm:$0xff]  ;;  %v283_v35 = vunpack.c.l.s4 %v2231_v34  ;;  %v2232_v39 = vmov 1934713408   ;;  %vm292_vm1 = vcmask 1047556   ;;  %vm974_vm2 = vcmask 64512  }
  0x1b   :  { %v297_v40 = vunpack.c.l.s4 %v2232_v39  ;;  %vm1234_vm3 = vcmask 1043456   ;;  %s2233_s7 = smov 24   ;;  %s2234_s10 = smov 16   ;;  %vm1631_vm4 = vcmask 130048   ;;  %vm1634_vm5 = vcmask 195584  }
  0x1c   :  { %197 = vmatpush.bf16.msra.mxu1 %v1996_v3  ;;  %v2414_v37 = vunpack.c.0.s8 %v283_v35  ;;  %s2235_s20 = smov 8   ;;  %vm1817_vm13 = vcmask 523264   ;;  %s1901_s2 = sshll.u32 %s2956_s18, 4  ;;  %s1902_s2 = int_to_ptr.hbm [resolvable:$true] %s1901_s2 }
  0x1d   :  { %v1995_v0 = vld [vmem:[%s2963_s1 + $0x8] sm:$0xff]  ;;  %v1994_v2 = vld [vmem:[%s2963_s1] sm:$0xff]  ;;  %234 = vmatpush.bf16.msra.mxu2 %v1998_v12  ;;  %s2230_s1 = smov 120   ;;  %v2417_v50 = vunpack.c.0.s8 %v297_v40  ;;  %s2237_s23 = smov [#allocation10]  }
  0x1e   :  { %v124_v4 = vld [vmem:[%s2964_s24] sm:$0xff]  ;;  %v125_v5 = vld [vmem:[%s2964_s24 + $0x8] sm:$0xff]  ;;  %162 = vmatpush.bf16.msra.mxu0 %v1995_v0  ;;  %s1899_s21 = sshll.u32 %s2237_s23, 4  ;;  %s1900_s21 = int_to_ptr.vmem [resolvable:$true] %s1899_s21 }
  0x1f   :  { %v126_v6 = vld [vmem:[%s2965_s6] sm:$0xff]  ;;  %v127_v7 = vld [vmem:[%s2965_s6 + $0x8] sm:$0xff]  ;;  %v131_v13 = vpack.c.bf16 %v125_v5, %v124_v4 }
  0x20   :  { %v128_v9 = vadd.f32 %v126_v6, %v124_v4  ;;  %v129_v10 = vadd.f32 %v127_v7, %v125_v5 }
  0x21   :  { %1942 = vmatmul.msk.bf16.vlgmr.msra.gmra.mxu2 %vm152_vm0, %v131_v13 }
  0x22   :  { %v130_v11 = vpack.c.bf16 %v129_v10, %v128_v9  ;;  %163 = vmatpush.bf16.msra.mxu0 %v1994_v2 }
  0x24   :  { %1933 = vmatmul.msk.bf16.vlgmr.msra.gmra.mxu1 %vm152_vm0, %v130_v11 }
  0x25   :  { %1924 = vmatmul.msk.bf16.vlgmr.msra.gmra.mxu0 %vm152_vm0, %v130_v11 }
  0xa1   :  { %v199_v15 = vpop.f32.mrf.mxu1 }
  0xa2   :  { %v200_v17 = vadd.f32 %v2041_v14, %v199_v15  ;;  %v165_v18 = vpop.f32.mrf.mxu0 }
  0xa3   :  { %v166_v20 = vadd.f32 %v2040_v16, %v165_v18 }
  0xa4   :  { %v486_v19 = vpack.c.bf16 %v200_v17, %v200_v17  ;;  %v236_v30 = vpop.f32.mrf.mxu2 }
  0xa5   :  { %v2376_v22 = vpack.c.bf16 %v166_v20, %v166_v20  ;;  %v237_v32 = vadd.f32 %v2403_v29, %v236_v30 }
  0xa6   :  { %498 = vrot.lane.b32.xlu2 %v486_v19, %s2228_s8  ;;  %494 = vrot.lane.b32.xlu1 %v486_v19, %s2229_s0  ;;  %v505_v46 = vshrl.u32 %v486_v19, 16 }
  0xa7   :  { %490 = vrot.lane.b32.xlu0 %v486_v19, %s2230_s1  ;;  %v2408_v33 = vpack.c.bf16 %v237_v32, %v237_v32  ;;  %v260_v58 = vshrl.u32 %v2376_v22, 16 }
  0xa9   :  { %v201_v21 = vpop.f32.mrf.mxu1 }
  0xaa   :  { %v202_v23 = vadd.f32 %v2041_v14, %v201_v21  ;;  %v167_v25 = vpop.f32.mrf.mxu0 }
  0xab   :  { %v168_v26 = vadd.f32 %v2040_v16, %v167_v25 }
  0xac   :  { %v2378_v24 = vpack.c.bf16 %v202_v23, %v202_v23 }
  0xad   :  { %v2386_v27 = vpack.c.bf16 %v168_v26, %v168_v26 }
  0xae   :  { %496 = vrot.lane.b32.xlu1 %v2378_v24, %s2229_s0  ;;  %249 = vrot.lane.b32.xlu2 %v2376_v22, %s2229_s0  ;;  %v517_v57 = vshrl.u32 %v2378_v24, 16 }
  0xaf   :  { %492 = vrot.lane.b32.xlu0 %v2378_v24, %s2230_s1  ;;  %v272_v62 = vshrl.u32 %v2386_v27, 16 }
  0xb6   :  { %247 = vrot.lane.b32.xlu1 %v2386_v27, %s2230_s1  ;;  %500 = vrot.lane.b32.xlu2 %v2378_v24, %s2228_s8 }
  0xb7   :  { %245 = vrot.lane.b32.xlu0 %v2376_v22, %s2230_s1 }
  0xbe   :  { %253 = vrot.lane.b32.xlu1 %v2376_v22, %s2228_s8  ;;  %255 = vrot.lane.b32.xlu2 %v2386_v27, %s2228_s8 }
  0xbf   :  { %251 = vrot.lane.b32.xlu0 %v2386_v27, %s2229_s0 }
  0xc6   :  { %734 = vrot.lane.b32.xlu1 %v2408_v33, %s2230_s1 }
  0xc7   :  { %738 = vrot.lane.b32.xlu0 %v2408_v33, %s2229_s0 }
 0x100   :  { %v499_v28 = vpop.permute.xlu2 %498 }
 0x101   :  { %v512_v41 = vshrl.u32 %v499_v28, 16 }
 0x108   :  { %v2405_v31 = vpop.permute.xlu2 %249 }
 0x109   :  { %v266_v59 = vshrl.u32 %v2405_v31, 16 }
 0x110   :  { %v501_v36 = vpop.permute.xlu2 %500 }
 0x111   :  { %v524_v63 = vshrl.u32 %v501_v36, 16 }
 0x118   :  { %v495_v38 = vpop.permute.xlu1 %494  ;;  %v2431_v6 = vpop.permute.xlu2 %255 }
 0x119   :  { %v510_v42 = vpack.i.b16 %v499_v28, %v495_v38  ;;  %v511_v43 = vshrl.u32 %v495_v38, 16  ;;  %v491_v44 = vpop.permute.xlu0 %490 }
 0x11a   :  { %v504_v45 = vpack.i.b16 %v491_v44, %v486_v19  ;;  %v506_v47 = vshrl.u32 %v491_v44, 16  ;;  %v279_v19 = vshrl.u32 %v2431_v6, 16 }
 0x11b   :  { %v513_v48 = vpack.i.b16 %v512_v41, %v511_v43  ;;  %v535_v49 = vperm.slane %v510_v42, %v2414_v37 }
 0x11c   :  { %v507_v51 = vpack.i.b16 %v506_v47, %v505_v46  ;;  %v530_v52 = vperm.slane %v504_v45, %v2414_v37 }
 0x11d   :  { %v536_v53 = vrot.slane %v535_v49, 4  ;;  %v561_v54 = vperm.slane %v513_v48, %v2414_v37 }
 0x11e   :  { %v538_v55 = vrot.slane %v530_v52, 4  ;;  %v556_v56 = vperm.slane %v507_v51, %v2414_v37 }
 0x11f   :  { %v562_v60 = vrot.slane %v561_v54, 4  ;;  %v537_v61 = vsel %vm292_vm1, %v536_v53, %v530_v52 }
 0x120   :  { %v539_v0 = vsel %vm292_vm1, %v535_v49, %v538_v55  ;;  %v543_v1 = vperm.slane %v537_v61, %v2417_v50  ;;  %v564_v2 = vrot.slane %v556_v56, 4  ;;  %v497_v3 = vpop.permute.xlu1 %496 }
 0x121   :  { %v547_v4 = vperm.slane %v539_v0, %v2417_v50  ;;  %v563_v5 = vsel %vm292_vm1, %v562_v60, %v556_v56  ;;  %v522_v7 = vpack.i.b16 %v501_v36, %v497_v3  ;;  %v523_v8 = vshrl.u32 %v497_v3, 16  ;;  %v493_v9 = vpop.permute.xlu0 %492 }
 0x122   :  { %v548_v10 = vrot.slane %v543_v1, 4  ;;  %v565_v11 = vsel %vm292_vm1, %v561_v54, %v564_v2  ;;  %v569_v12 = vperm.slane %v563_v5, %v2417_v50  ;;  %v516_v13 = vpack.i.b16 %v493_v9, %v2378_v24 }
 0x123   :  { %v550_v14 = vrot.slane %v547_v4, 4  ;;  %v573_v15 = vperm.slane %v565_v11, %v2417_v50  ;;  %v525_v16 = vpack.i.b16 %v524_v63, %v523_v8  ;;  %v587_v17 = vperm.slane %v522_v7, %v2414_v37 }
 0x124   :  { %v574_v18 = vrot.slane %v569_v12, 4  ;;  %v518_v20 = vshrl.u32 %v493_v9, 16  ;;  %v582_v21 = vperm.slane %v516_v13, %v2414_v37  ;;  %v549_v24 = vsel %vm292_vm1, 0, %v548_v10 }
 0x125   :  { %v551_v23 = vsel %vm292_vm1, 0, %v550_v14  ;;  %v576_v25 = vrot.slane %v573_v15, 4  ;;  %v588_v26 = vrot.slane %v587_v17, 4  ;;  %v613_v28 = vperm.slane %v525_v16, %v2414_v37 }
 0x126   :  { %v575_v30 = vsel %vm292_vm1, 0, %v574_v18  ;;  %v519_v32 = vpack.i.b16 %v518_v20, %v517_v57  ;;  %v590_v34 = vrot.slane %v582_v21, 4  ;;  %v635_v36 = vrot.slane %v551_v23, 4 }
 0x127   :  { %v577_v35 = vsel %vm292_vm1, 0, %v576_v25  ;;  %v614_v38 = vrot.slane %v613_v28, 4  ;;  %v589_v39 = vsel %vm292_vm1, %v588_v26, %v582_v21  ;;  %v630_v44 = vsel %vm292_vm1, %v550_v14, %v543_v1 }
 0x128   :  { %v591_v40 = vsel %vm292_vm1, %v587_v17, %v590_v34  ;;  %v595_v41 = vperm.slane %v589_v39, %v2417_v50  ;;  %v608_v42 = vperm.slane %v519_v32, %v2414_v37  ;;  %v248_v43 = vpop.permute.xlu1 %247  ;;  %v654_v45 = vrot.slane %v577_v35, 4 }
 0x129   :  { %v599_v46 = vperm.slane %v591_v40, %v2417_v50  ;;  %v271_v47 = vpack.i.b16 %v248_v43, %v2386_v27  ;;  %v273_v48 = vshrl.u32 %v248_v43, 16  ;;  %v246_v49 = vpop.permute.xlu0 %245  ;;  %v634_v0 = vperm.slane %v630_v44, %v2414_v37 }
 0x12a   :  { %v600_v51 = vrot.slane %v595_v41, 4  ;;  %v615_v52 = vsel %vm292_vm1, %v614_v38, %v608_v42  ;;  %v616_v53 = vrot.slane %v608_v42, 4  ;;  %v259_v54 = vpack.i.b16 %v246_v49, %v2376_v22 }
 0x12b   :  { %v602_v55 = vrot.slane %v599_v46, 4  ;;  %v2455_v56 = vperm.slane %v615_v52, %v2417_v50  ;;  %v274_v57 = vpack.i.b16 %v273_v48, %v272_v62  ;;  %v338_v60 = vperm.slane %v271_v47, %v2414_v37 }
 0x12c   :  { %v617_v61 = vsel %vm292_vm1, %v613_v28, %v616_v53  ;;  %v261_v63 = vshrl.u32 %v246_v49, 16  ;;  %v285_v27 = vperm.slane %v259_v54, %v2414_v37  ;;  %v2462_v1 = vsel %vm292_vm1, 0, %v600_v51 }
 0x12d   :  { %v2465_v2 = vsel %vm292_vm1, 0, %v602_v55  ;;  %v625_v3 = vperm.slane %v617_v61, %v2417_v50  ;;  %v626_v4 = vrot.slane %v2455_v56, 4  ;;  %v346_v5 = vrot.slane %v338_v60, 4 }
 0x12e   :  { %v673_v62 = vrot.slane %v2465_v2, 4  ;;  %v2471_v7 = vperm.slane %v274_v57, %v2414_v37  ;;  %v262_v8 = vpack.i.b16 %v261_v63, %v260_v58  ;;  %v294_v10 = vrot.slane %v285_v27, 4 }
 0x12f   :  { %v2475_v9 = vrot.slane %v625_v3, 4  ;;  %v636_v11 = vsel %vm292_vm1, %v635_v36, %v549_v24  ;;  %v2479_v13 = vsel %vm292_vm1, %v576_v25, %v569_v12  ;;  %v2482_v14 = vsel %vm292_vm1, 0, %v626_v4 }
 0x130   :  { %v372_v15 = vrot.slane %v2471_v7, 4  ;;  %v312_v16 = vperm.slane %v262_v8, %v2414_v37  ;;  %v254_v17 = vpop.permute.xlu1 %253  ;;  %v640_v18 = vperm.slane %v636_v11, %v2414_v37  ;;  %v655_v12 = vsel %vm292_vm1, %v654_v45, %v575_v30 }
 0x131   :  { %v2489_v22 = vsel %vm292_vm1, 0, %v2475_v9  ;;  %v265_v58 = vpack.i.b16 %v254_v17, %v2405_v31  ;;  %v267_v20 = vshrl.u32 %v254_v17, 16  ;;  %v252_v21 = vpop.permute.xlu0 %251  ;;  %v653_v28 = vperm.slane %v2479_v13, %v2414_v37 }
 0x132   :  { %v692_v23 = vrot.slane %v2489_v22, 4  ;;  %v277_v25 = vpack.i.b16 %v2431_v6, %v252_v21  ;;  %v278_v26 = vshrl.u32 %v252_v21, 16  ;;  %v320_v24 = vrot.slane %v312_v16, 4 }
 0x133   :  { %v268_v32 = vpack.i.b16 %v267_v20, %v266_v59  ;;  %v290_v34 = vperm.slane %v265_v58, %v2414_v37  ;;  %v641_v35 = vrot.slane %v640_v18, 4  ;;  %v659_v38 = vperm.slane %v655_v12, %v2414_v37 }
 0x134   :  { %v280_v36 = vpack.i.b16 %v279_v19, %v278_v26  ;;  %v343_v30 = vperm.slane %v277_v25, %v2414_v37  ;;  %v2505_v39 = vsel %vm292_vm1, %v602_v55, %v595_v41 }
 0x135   :  { %v291_v40 = vrot.slane %v290_v34, 4  ;;  %v295_v42 = vsel %vm292_vm1, %v290_v34, %v294_v10  ;;  %v317_v43 = vperm.slane %v268_v32, %v2414_v37  ;;  %v642_v31 = vsel %vm292_vm1, %v641_v35, %v634_v0 }
 0x136   :  { %v303_v59 = vperm.slane %v295_v42, %v2417_v50  ;;  %v344_v44 = vrot.slane %v343_v30, 4  ;;  %v347_v6 = vsel %vm292_vm1, %v343_v30, %v346_v5  ;;  %v369_v19 = vperm.slane %v280_v36, %v2414_v37 }
 0x137   :  { %v293_v45 = vsel %vm292_vm1, %v291_v40, %v285_v27  ;;  %v318_v46 = vrot.slane %v317_v43, 4  ;;  %v321_v41 = vsel %vm292_vm1, %v317_v43, %v320_v24  ;;  %v355_v47 = vperm.slane %v347_v6, %v2417_v50 }
 0x138   :  { %v299_v48 = vperm.slane %v293_v45, %v2417_v50  ;;  %v306_v49 = vrot.slane %v303_v59, 4  ;;  %v329_v51 = vperm.slane %v321_v41, %v2417_v50  ;;  %v345_v52 = vsel %vm292_vm1, %v344_v44, %v338_v60 }
 0x139   :  { %v319_v53 = vsel %vm292_vm1, %v318_v46, %v312_v16  ;;  %v351_v54 = vperm.slane %v345_v52, %v2417_v50  ;;  %v358_v55 = vrot.slane %v355_v47, 4  ;;  %v370_v57 = vrot.slane %v369_v19, 4 }
 0x13a   :  { %v304_v61 = vrot.slane %v299_v48, 4  ;;  %v2522_v63 = vsel %vm292_vm1, 0, %v306_v49  ;;  %v2525_v27 = vperm.slane %v319_v53, %v2417_v50  ;;  %v2527_v0 = vrot.slane %v329_v51, 4 }
 0x13b   :  { %v2530_v3 = vsel %vm292_vm1, %v306_v49, %v299_v48  ;;  %v391_v60 = vrot.slane %v2522_v63, 4  ;;  %v356_v4 = vrot.slane %v351_v54, 4  ;;  %v359_v5 = vsel %vm292_vm1, 0, %v358_v55  ;;  %v238_v49 = vpop.f32.mrf.mxu2 }
 0x13c   :  { %v305_v8 = vsel %vm292_vm1, 0, %v304_v61  ;;  %v330_v10 = vrot.slane %v2525_v27, 4  ;;  %v2538_v11 = vsel %vm292_vm1, 0, %v2527_v0  ;;  %v371_v13 = vsel %vm292_vm1, %v370_v57, %v2471_v7 }
 0x13d   :  { %v410_v16 = vrot.slane %v2538_v11, 4  ;;  %v357_v17 = vsel %vm292_vm1, 0, %v356_v4  ;;  %v373_v18 = vsel %vm292_vm1, %v369_v19, %v372_v15  ;;  %v377_v58 = vperm.slane %v371_v13, %v2417_v50 }
 0x13e   :  { %v331_v20 = vsel %vm292_vm1, 0, %v330_v10  ;;  %v381_v21 = vperm.slane %v373_v18, %v2417_v50  ;;  %v2549_v12 = vsel %vm292_vm1, %v358_v55, %v351_v54  ;;  %v429_v25 = vrot.slane %v359_v5, 4 }
 0x13f   :  { %v382_v26 = vrot.slane %v377_v58, 4  ;;  %v428_v7 = vperm.slane %v2549_v12, %v2414_v37  ;;  %v646_v24 = vperm.slane %v642_v31, %v2417_v50  ;;  %v660_v32 = vrot.slane %v659_v38, 4 }
 0x140   :  { %v384_v34 = vrot.slane %v381_v21, 4  ;;  %v430_v15 = vsel %vm292_vm1, %v429_v25, %v357_v17  ;;  %v672_v35 = vperm.slane %v2505_v39, %v2414_v37  ;;  %v674_v36 = vsel %vm292_vm1, %v673_v62, %v2462_v1 }
 0x141   :  { %v383_v30 = vsel %vm292_vm1, 0, %v382_v26  ;;  %v434_v40 = vperm.slane %v430_v15, %v2414_v37  ;;  %v661_v42 = vsel %vm292_vm1, %v660_v32, %v653_v28  ;;  %v709_v43 = vshrl.u32 %v646_v24, 16 }
 0x142   :  { %v385_v38 = vsel %vm292_vm1, 0, %v384_v34  ;;  %v2566_v31 = vsel %vm292_vm1, %v384_v34, %v377_v58  ;;  %v665_v59 = vperm.slane %v661_v42, %v2417_v50  ;;  %v647_v39 = vrot.slane %v646_v24, 4 }
 0x143   :  { %v447_v2 = vperm.slane %v2566_v31, %v2414_v37  ;;  %v448_v44 = vrot.slane %v385_v38, 4  ;;  %v678_v1 = vperm.slane %v674_v36, %v2414_v37  ;;  %v687_v62 = vsel %vm292_vm1, %v2475_v9, %v2455_v56 }
 0x144   :  { %v708_v28 = vpack.i.b16 %v665_v59, %v646_v24  ;;  %v710_v6 = vshrl.u32 %v665_v59, 16  ;;  %v648_v19 = vsel %vm292_vm1, 0, %v647_v39  ;;  %v666_v45 = vrot.slane %v665_v59, 4 }
 0x145   :  { %v449_v46 = vsel %vm292_vm1, %v448_v44, %v383_v30  ;;  %v715_v41 = vshrl.u32 %v648_v19, 16  ;;  %v679_v47 = vrot.slane %v678_v1, 4  ;;  %v691_v48 = vperm.slane %v687_v62, %v2414_v37 }
 0x146   :  { %v979_v51 = vsel %vm974_vm2, %v708_v28, 0  ;;  %v711_v52 = vpack.i.b16 %v710_v6, %v709_v43  ;;  %v667_v53 = vsel %vm292_vm1, 0, %v666_v45  ;;  %v693_v56 = vsel %vm292_vm1, %v692_v23, %v2482_v14 }
 0x147   :  { %988 = vmatpush.bf16.xpose.msra.mxu3 %v979_v51  ;;  %v714_v9 = vpack.i.b16 %v667_v53, %v648_v19  ;;  %v716_v54 = vshrl.u32 %v667_v53, 16  ;;  %v680_v55 = vsel %vm292_vm1, %v679_v47, %v672_v35  ;;  %v697_v57 = vperm.slane %v693_v56, %v2414_v37 }
 0x148   :  { %v1017_v61 = vsel %vm974_vm2, %v711_v52, 0  ;;  %v684_v4 = vperm.slane %v680_v55, %v2417_v50  ;;  %v239_v5 = vadd.f32 %v2403_v29, %v238_v49  ;;  %v390_v10 = vperm.slane %v2530_v3, %v2414_v37 }
 0x149   :  { %1026 = vmatpush.bf16.xpose.msrb.mxu1 %v1017_v61  ;;  %v1055_v22 = vsel %vm974_vm2, %v714_v9, 0  ;;  %v717_v14 = vpack.i.b16 %v716_v54, %v715_v41  ;;  %v698_v23 = vrot.slane %v697_v57, 4  ;;  %v392_v13 = vsel %vm292_vm1, %v391_v60, %v305_v8 }
 0x14a   :  { %v721_v17 = vshrl.u32 %v684_v4, 16  ;;  %v685_v18 = vrot.slane %v684_v4, 4  ;;  %v2595_v58 = vpack.c.bf16 %v239_v5, %v239_v5  ;;  %v396_v21 = vperm.slane %v392_v13, %v2414_v37 }
 0x14b   :  { %v1093_v29 = vsel %vm974_vm2, %v717_v14, 0  ;;  %v699_v3 = vsel %vm292_vm1, %v698_v23, %v691_v48  ;;  %v405_v25 = vsel %vm292_vm1, %v2527_v0, %v2525_v27  ;;  %v411_v63 = vsel %vm292_vm1, %v410_v16, %v331_v20 }
 0x14c   :  { %v703_v60 = vperm.slane %v699_v3, %v2417_v50  ;;  %v686_v8 = vsel %vm292_vm1, 0, %v685_v18  ;;  %736 = vrot.lane.b32.xlu2 %v2595_v58, %s2230_s1  ;;  %v397_v26 = vrot.slane %v396_v21, 4  ;;  %v409_v24 = vperm.slane %v405_v25, %v2414_v37 }
 0x14d   :  { %v727_v32 = vshrl.u32 %v686_v8, 16  ;;  %v415_v34 = vperm.slane %v411_v63, %v2414_v37  ;;  %v435_v15 = vrot.slane %v434_v40, 4  ;;  %v453_v27 = vperm.slane %v449_v46, %v2414_v37 }
 0x14e   :  { %v720_v0 = vpack.i.b16 %v703_v60, %v684_v4  ;;  %v722_v11 = vshrl.u32 %v703_v60, 16  ;;  %v704_v16 = vrot.slane %v703_v60, 4  ;;  %v398_v20 = vsel %vm292_vm1, %v397_v26, %v390_v10 }
 0x14f   :  { %1064 = vmatpush.bf16.xpose.msrb.mxu3 %v1055_v22  ;;  %v402_v35 = vperm.slane %v398_v20, %v2417_v50  ;;  %v416_v36 = vrot.slane %v415_v34, 4  ;;  %v436_v30 = vsel %vm292_vm1, %v435_v15, %v428_v7  ;;  %v454_v42 = vrot.slane %v453_v27, 4 }
 0x150   :  { %v998_v43 = vsel %vm974_vm2, %v720_v0, 0  ;;  %v723_v38 = vpack.i.b16 %v722_v11, %v721_v17  ;;  %v705_v40 = vsel %vm292_vm1, 0, %v704_v16  ;;  %v440_v59 = vperm.slane %v436_v30, %v2417_v50 }
 0x151   :  { %1102 = vmatpush.bf16.xpose.msra.mxu1 %v1093_v29  ;;  %1007 = vmatpush.bf16.xpose.msrb.mxu0 %v998_v43  ;;  %v726_v39 = vpack.i.b16 %v705_v40, %v686_v8  ;;  %v728_v44 = vshrl.u32 %v705_v40, 16  ;;  %v417_v1 = vsel %vm292_vm1, %v416_v36, %v409_v24  ;;  %v455_v12 = vsel %vm292_vm1, %v454_v42, %v447_v2 }
 0x152   :  { %v1036_v7 = vsel %vm974_vm2, %v723_v38, 0  ;;  %v421_v62 = vperm.slane %v417_v1, %v2417_v50  ;;  %v459_v28 = vperm.slane %v455_v12, %v2417_v50  ;;  %v465_v45 = vshrl.u32 %v402_v35, 16 }
 0x153   :  { %1045 = vmatpush.bf16.xpose.msrb.mxu2 %v1036_v7  ;;  %v1074_v6 = vsel %vm974_vm2, %v726_v39, 0  ;;  %v729_v19 = vpack.i.b16 %v728_v44, %v727_v32  ;;  %v477_v46 = vshrl.u32 %v440_v59, 16  ;;  %v403_v53 = vrot.slane %v402_v35, 4 }
 0x154   :  { %v464_v41 = vpack.i.b16 %v421_v62, %v402_v35  ;;  %v476_v47 = vpack.i.b16 %v459_v28, %v440_v59  ;;  %v466_v48 = vshrl.u32 %v421_v62, 16  ;;  %v478_v49 = vshrl.u32 %v459_v28, 16 }
 0x155   :  { %v1112_v31 = vsel %vm974_vm2, %v729_v19, 0  ;;  %v422_v52 = vrot.slane %v421_v62, 4  ;;  %v460_v56 = vrot.slane %v459_v28, 4  ;;  %v441_v54 = vrot.slane %v440_v59, 4  ;;  %v735_v19 = vpop.permute.xlu1 %734 }
 0x156   :  { %1943 = vmatmul.msk.bf16.vlgmr.msra.gmra.mxu3 %vm974_vm2, %v464_v41  ;;  %v467_v2 = vpack.i.b16 %v466_v48, %v465_v45  ;;  %v479_v51 = vpack.i.b16 %v478_v49, %v477_v46  ;;  %v404_v55 = vsel %vm292_vm1, 0, %v403_v53 }
 0x157   :  { %v423_v9 = vsel %vm292_vm1, 0, %v422_v52  ;;  %v461_v57 = vsel %vm292_vm1, 0, %v460_v56  ;;  %v442_v4 = vsel %vm292_vm1, 0, %v441_v54  ;;  %v471_v10 = vshrl.u32 %v404_v55, 16 }
 0x158   :  { %1944 = vmatmul.msk.bf16.vlgmr.msrb.gmra.mxu0 %vm974_vm2, %v476_v47  ;;  %1945 = vmatmul.msk.bf16.vlgmr.msrb.gmra.mxu1 %vm974_vm2, %v467_v2  ;;  %v472_v61 = vshrl.u32 %v423_v9, 16  ;;  %v470_v5 = vpack.i.b16 %v423_v9, %v404_v55  ;;  %v484_v22 = vshrl.u32 %v461_v57, 16  ;;  %v482_v23 = vpack.i.b16 %v461_v57, %v442_v4 }
 0x159   :  { %1083 = vmatpush.bf16.xpose.msra.mxu0 %v1074_v6  ;;  %v483_v13 = vshrl.u32 %v442_v4, 16  ;;  %v2663_v6 = vpop.permute.xlu0 %738 }
 0x15a   :  { %1946 = vmatmul.msk.bf16.vlgmr.msrb.gmra.mxu2 %vm974_vm2, %v479_v51  ;;  %v473_v14 = vpack.i.b16 %v472_v61, %v471_v10 }
 0x15b   :  { %1121 = vmatpush.bf16.xpose.msra.mxu2 %v1112_v31  ;;  %v485_v17 = vpack.i.b16 %v484_v22, %v483_v13 }
 0x166   :  { %1947 = vmatmul.msk.bf16.vlgmr.msrb.gmra.mxu3 %vm974_vm2, %v470_v5 }
 0x168   :  { %1948 = vmatmul.msk.bf16.vlgmr.msra.gmra.mxu0 %vm974_vm2, %v482_v23  ;;  %1949 = vmatmul.msk.bf16.vlgmr.msra.gmra.mxu1 %vm974_vm2, %v473_v14 }
 0x16a   :  { %1950 = vmatmul.msk.bf16.vlgmr.msra.gmra.mxu2 %vm974_vm2, %v485_v17 }
 0x1a6   :  { %v2661_v28 = vpop.permute.xlu2 %736 }
 0x1d5   :  { %v1009_v18 = vpop.f32.mrf.mxu0  ;;  %v1028_v21 = vpop.f32.mrf.mxu1 }
 0x1d6   :  { %v1129_v29 = vmul.f32 0.35355338, %v1028_v21  ;;  %v1128_v60 = vmul.f32 0.35355338, %v1009_v18 }
 0x1d8   :  { %v1141_v3 = vsel %vm974_vm2, %v1129_v29, -inf  ;;  %v1138_v27 = vsel %vm974_vm2, %v1128_v60, -inf }
 0x1d9   :  { %1142 = vmax.xlane.f32.xlu2 %v1141_v3  ;;  %v990_v25 = vpop.f32.mrf.mxu3 }
 0x1da   :  { %v1127_v63 = vmul.f32 0.35355338, %v990_v25 }
 0x1dc   :  { %v1135_v8 = vsel %vm974_vm2, %v1127_v63, -inf }
 0x1dd   :  { %v1011_v26 = vpop.f32.mrf.mxu0  ;;  %v1047_v24 = vpop.f32.mrf.mxu2  ;;  %1136 = vmax.xlane.f32.xlu0 %v1135_v8 }
 0x1de   :  { %v1130_v32 = vmul.f32 0.35355338, %v1047_v24  ;;  %v1030_v34 = vpop.f32.mrf.mxu1 }
 0x1df   :  { %v749_v34 = vshrl.u32 %v2408_v33, 16 }
 0x1e0   :  { %v1144_v15 = vsel %vm974_vm2, %v1130_v32, -inf }
 0x1e1   :  { %1145 = vmax.xlane.f32.xlu1 %v1144_v15  ;;  %1139 = vmax.xlane.f32.xlu2 %v1138_v27  ;;  %v992_v0 = vpop.f32.mrf.mxu3  ;;  %v750_v15 = vshrl.u32 %v735_v19, 16 }
 0x1e5   :  { %v1049_v11 = vpop.f32.mrf.mxu2  ;;  %v1085_v16 = vpop.f32.mrf.mxu0 }
 0x1e6   :  { %v1132_v20 = vmul.f32 0.35355338, %v1085_v16  ;;  %v1104_v35 = vpop.f32.mrf.mxu1  ;;  %v748_v11 = vpack.i.b16 %v735_v19, %v2408_v33  ;;  %v751_v16 = vpack.i.b16 %v750_v15, %v749_v34 }
 0x1e7   :  { %v2648_v36 = vmul.f32 0.35355338, %v1104_v35  ;;  %v760_v35 = vpack.i.b16 %v2661_v28, %v2595_v58 }
 0x1e8   :  { %v1150_v30 = vsel %vm974_vm2, %v1132_v20, -inf }
 0x1e9   :  { %1151 = vmax.xlane.f32.xlu2 %v1150_v30  ;;  %v1153_v42 = vsel %vm974_vm2, %v2648_v36, -inf  ;;  %v1066_v43 = vpop.f32.mrf.mxu3  ;;  %v800_v30 = vperm.slane %v751_v16, %v2414_v37 }
 0x1ea   :  { %1154 = vmax.xlane.f32.xlu0 %v1153_v42  ;;  %v1131_v38 = vmul.f32 0.35355338, %v1066_v43  ;;  %v761_v42 = vshrl.u32 %v2595_v58, 16  ;;  %v762_v43 = vshrl.u32 %v2661_v28, 16 }
 0x1ec   :  { %v1147_v12 = vsel %vm974_vm2, %v1131_v38, -inf  ;;  %v763_v19 = vpack.i.b16 %v762_v43, %v761_v42 }
 0x1ed   :  { %v1087_v40 = vpop.f32.mrf.mxu0  ;;  %v1123_v59 = vpop.f32.mrf.mxu2 }
 0x1ee   :  { %v1134_v39 = vmul.f32 0.35355338, %v1123_v59  ;;  %v1106_v44 = vpop.f32.mrf.mxu1  ;;  %v755_v40 = vshrl.u32 %v2663_v6, 16 }
 0x1ef   :  { %v826_v44 = vperm.slane %v760_v35, %v2414_v37 }
 0x1f0   :  { %v1156_v1 = vsel %vm974_vm2, %v1134_v39, -inf }
 0x1f1   :  { %1157 = vmax.xlane.f32.xlu1 %v1156_v1  ;;  %v1068_v7 = vpop.f32.mrf.mxu3 }
 0x1f2   :  { %1148 = vmax.xlane.f32.xlu0 %v1147_v12 }
 0x1f5   :  { %v1125_v62 = vpop.f32.mrf.mxu2 }
 0x201   :  { %744 = vrot.lane.b32.xlu2 %v2595_v58, %s2228_s8 }
 0x206   :  { %742 = vrot.lane.b32.xlu0 %v2408_v33, %s2228_s8 }
 0x20a   :  { %740 = vrot.lane.b32.xlu1 %v2595_v58, %s2229_s0  ;;  %v808_v58 = vrot.slane %v800_v30, 4 }
 0x24c   :  { %v1143_v45 = vpop.xlane.xlu2 %1142 }
 0x24d   :  { %v1161_v47 = vsub.f32 %v1129_v29, %v1143_v45 }
 0x24f   :  { %v1171_v52 = vmul.f32 1.442695, %v1161_v47  ;;  %v834_v47 = vrot.slane %v826_v44, 4 }
 0x250   :  { %v1137_v46 = vpop.xlane.xlu0 %1136 }
 0x251   :  { %v1159_v41 = vsub.f32 %v1127_v63, %v1137_v46 }
 0x253   :  { %v1167_v48 = vmul.f32 1.442695, %v1159_v41 }
 0x254   :  { %v1146_v49 = vpop.xlane.xlu1 %1145  ;;  %v1140_v31 = vpop.xlane.xlu2 %1139 }
 0x255   :  { %2050 = vpow2.f32 %v1167_v48  ;;  %v1162_v2 = vsub.f32 %v1130_v32, %v1146_v49  ;;  %v1160_v51 = vsub.f32 %v1128_v60, %v1140_v31 }
 0x257   :  { %v1173_v53 = vmul.f32 1.442695, %v1162_v2  ;;  %v1169_v56 = vmul.f32 1.442695, %v1160_v51 }
 0x259   :  { %2052 = vpow2.f32 %v1173_v53 }
 0x25a   :  { %2054 = vpow2.f32 %v1169_v56  ;;  %v852_v56 = vperm.slane %v763_v19, %v2414_v37 }
 0x25b   :  { %v2665_v9 = vpop.eup %2050  ;;  %2056 = vpow2.f32 %v1171_v52 }
 0x25c   :  { %v1152_v54 = vpop.xlane.xlu2 %1151  ;;  %v1183_v55 = vsel %vm974_vm2, %v2665_v9, 0.0  ;;  %v860_v34 = vrot.slane %v852_v56, 4 }
 0x25d   :  { %v1164_v57 = vsub.f32 %v1132_v20, %v1152_v54  ;;  %v1155_v61 = vpop.xlane.xlu0 %1154  ;;  %1184 = vadd.xlane.f32.xlu1 %v1183_v55 }
 0x25e   :  { %v1165_v25 = vsub.f32 %v2648_v36, %v1155_v61  ;;  %v774_v36 = vperm.slane %v748_v11, %v2414_v37 }
 0x25f   :  { %v2669_v4 = vpop.eup %2052  ;;  %v1177_v5 = vmul.f32 1.442695, %v1164_v57 }
 0x260   :  { %v2671_v10 = vpop.eup %2054  ;;  %v1192_v22 = vsel %vm974_vm2, %v2669_v4, 0.0  ;;  %v1179_v8 = vmul.f32 1.442695, %v1165_v25  ;;  %v782_v1 = vrot.slane %v774_v36, 4 }
 0x261   :  { %v2675_v14 = vpop.eup %2056  ;;  %1193 = vadd.xlane.f32.xlu0 %v1192_v22  ;;  %v1186_v23 = vsel %vm974_vm2, %v2671_v10, 0.0  ;;  %2058 = vpow2.f32 %v1177_v5 }
 0x262   :  { %1187 = vadd.xlane.f32.xlu2 %v1186_v23  ;;  %v1189_v17 = vsel %vm974_vm2, %v2675_v14, 0.0 }
 0x264   :  { %v1158_v13 = vpop.xlane.xlu1 %1157  ;;  %v745_v12 = vpop.permute.xlu2 %744 }
 0x265   :  { %v1166_v18 = vsub.f32 %v1134_v39, %v1158_v13  ;;  %v1149_v21 = vpop.xlane.xlu0 %1148  ;;  %1190 = vadd.xlane.f32.xlu1 %v1189_v17  ;;  %v768_v48 = vshrl.u32 %v745_v12, 16 }
 0x266   :  { %v1163_v29 = vsub.f32 %v1131_v38, %v1149_v21 }
 0x267   :  { %v1181_v3 = vmul.f32 1.442695, %v1166_v18  ;;  %v2682_v60 = vpop.eup %2058 }
 0x268   :  { %v1175_v63 = vmul.f32 1.442695, %v1163_v29  ;;  %v1198_v26 = vsel %vm974_vm2, %v2682_v60, 0.0 }
 0x269   :  { %2060 = vpow2.f32 %v1181_v3 }
 0x26a   :  { %2062 = vpow2.f32 %v1175_v63 }
 0x26b   :  { %2064 = vpow2.f32 %v1179_v8 }
 0x26d   :  { %1199 = vadd.xlane.f32.xlu1 %v1198_v26 }
 0x26f   :  { %v2686_v24 = vpop.eup %2060 }
 0x270   :  { %v2688_v32 = vpop.eup %2062  ;;  %v1204_v27 = vsel %vm974_vm2, %v2686_v24, 0.0 }
 0x271   :  { %1205 = vadd.xlane.f32.xlu2 %v1204_v27  ;;  %v1195_v0 = vsel %vm974_vm2, %v2688_v32, 0.0  ;;  %v2696_v20 = vpop.eup %2064 }
 0x272   :  { %1196 = vadd.xlane.f32.xlu0 %v1195_v0  ;;  %v1201_v39 = vsel %vm974_vm2, %v2696_v20, 0.0 }
 0x278   :  { %v743_v38 = vpop.permute.xlu0 %742 }
 0x279   :  { %v754_v59 = vpack.i.b16 %v743_v38, %v2663_v6  ;;  %v756_v33 = vshrl.u32 %v743_v38, 16 }
 0x27a   :  { %1202 = vadd.xlane.f32.xlu0 %v1201_v39 }
 0x27b   :  { %v757_v7 = vpack.i.b16 %v756_v33, %v755_v40  ;;  %v779_v62 = vperm.slane %v754_v59, %v2414_v37 }
 0x27c   :  { %v741_v28 = vpop.permute.xlu1 %740 }
 0x27d   :  { %v780_v45 = vrot.slane %v779_v62, 4  ;;  %v783_v46 = vsel %vm292_vm1, %v779_v62, %v782_v1  ;;  %v805_v6 = vperm.slane %v757_v7, %v2414_v37  ;;  %v766_v41 = vpack.i.b16 %v745_v12, %v741_v28 }
 0x27e   :  { %v791_v49 = vperm.slane %v783_v46, %v2417_v50  ;;  %v767_v31 = vshrl.u32 %v741_v28, 16 }
 0x27f   :  { %v781_v2 = vsel %vm292_vm1, %v780_v45, %v774_v36  ;;  %v806_v51 = vrot.slane %v805_v6, 4  ;;  %v809_v52 = vsel %vm292_vm1, %v805_v6, %v808_v58  ;;  %v831_v53 = vperm.slane %v766_v41, %v2414_v37 }
 0x280   :  { %v787_v54 = vperm.slane %v781_v2, %v2417_v50  ;;  %v794_v55 = vrot.slane %v791_v49, 4  ;;  %v817_v57 = vperm.slane %v809_v52, %v2417_v50  ;;  %v769_v5 = vpack.i.b16 %v768_v48, %v767_v31 }
 0x281   :  { %v807_v61 = vsel %vm292_vm1, %v806_v51, %v800_v30  ;;  %v832_v22 = vrot.slane %v831_v53, 4  ;;  %v835_v23 = vsel %vm292_vm1, %v831_v53, %v834_v47 }
 0x282   :  { %v792_v13 = vrot.slane %v787_v54, 4  ;;  %v795_v17 = vsel %vm292_vm1, 0, %v794_v55  ;;  %v813_v18 = vperm.slane %v807_v61, %v2417_v50  ;;  %v820_v21 = vrot.slane %v817_v57, 4 }
 0x283   :  { %v879_v29 = vrot.slane %v795_v17, 4  ;;  %v833_v3 = vsel %vm292_vm1, %v832_v22, %v826_v44  ;;  %v843_v25 = vperm.slane %v835_v23, %v2417_v50  ;;  %v857_v35 = vperm.slane %v769_v5, %v2414_v37 }
 0x284   :  { %v793_v63 = vsel %vm292_vm1, 0, %v792_v13  ;;  %v818_v8 = vrot.slane %v813_v18, 4  ;;  %v821_v26 = vsel %vm292_vm1, 0, %v820_v21  ;;  %v839_v0 = vperm.slane %v833_v3, %v2417_v50 }
 0x285   :  { %v880_v15 = vsel %vm292_vm1, %v879_v29, %v793_v63  ;;  %v898_v27 = vrot.slane %v821_v26, 4  ;;  %v846_v16 = vrot.slane %v843_v25, 4  ;;  %v874_v30 = vsel %vm292_vm1, %v794_v55, %v787_v54 }
 0x286   :  { %v819_v11 = vsel %vm292_vm1, 0, %v818_v8  ;;  %v884_v36 = vperm.slane %v880_v15, %v2414_v37  ;;  %v844_v42 = vrot.slane %v839_v0, 4  ;;  %v858_v40 = vrot.slane %v857_v35, 4 }
 0x287   :  { %v899_v43 = vsel %vm292_vm1, %v898_v27, %v819_v11  ;;  %v847_v38 = vsel %vm292_vm1, 0, %v846_v16  ;;  %v861_v59 = vsel %vm292_vm1, %v857_v35, %v860_v34  ;;  %v893_v33 = vsel %vm292_vm1, %v820_v21, %v813_v18 }
 0x288   :  { %v845_v39 = vsel %vm292_vm1, 0, %v844_v42  ;;  %v869_v44 = vperm.slane %v861_v59, %v2417_v50  ;;  %v917_v1 = vrot.slane %v847_v38, 4  ;;  %v878_v12 = vperm.slane %v874_v30, %v2414_v37 }
 0x289   :  { %v859_v7 = vsel %vm292_vm1, %v858_v40, %v852_v56  ;;  %v885_v62 = vrot.slane %v884_v36, 4  ;;  %v903_v58 = vperm.slane %v899_v43, %v2414_v37  ;;  %v912_v45 = vsel %vm292_vm1, %v846_v16, %v839_v0 }
 0x28a   :  { %v865_v19 = vperm.slane %v859_v7, %v2417_v50  ;;  %v872_v28 = vrot.slane %v869_v44, 4  ;;  %v918_v46 = vsel %vm292_vm1, %v917_v1, %v845_v39  ;;  %v897_v41 = vperm.slane %v893_v33, %v2414_v37 }
 0x28b   :  { %v886_v6 = vsel %vm292_vm1, %v885_v62, %v878_v12  ;;  %v904_v47 = vrot.slane %v903_v58, 4  ;;  %v922_v48 = vperm.slane %v918_v46, %v2414_v37  ;;  %v916_v51 = vperm.slane %v912_v45, %v2414_v37 }
 0x28c   :  { %v870_v49 = vrot.slane %v865_v19, 4  ;;  %v873_v31 = vsel %vm292_vm1, 0, %v872_v28  ;;  %v890_v2 = vperm.slane %v886_v6, %v2417_v50  ;;  %v931_v61 = vsel %vm292_vm1, %v872_v28, %v865_v19 }
 0x28d   :  { %v936_v52 = vrot.slane %v873_v31, 4  ;;  %v905_v53 = vsel %vm292_vm1, %v904_v47, %v897_v41  ;;  %v923_v56 = vrot.slane %v922_v48, 4  ;;  %v935_v8 = vperm.slane %v931_v61, %v2414_v37 }
 0x28e   :  { %v871_v54 = vsel %vm292_vm1, 0, %v870_v49  ;;  %v909_v55 = vperm.slane %v905_v53, %v2417_v50  ;;  %v891_v57 = vrot.slane %v890_v2, 4  ;;  %v953_v5 = vshrl.u32 %v890_v2, 16 }
 0x28f   :  { %v924_v22 = vsel %vm292_vm1, %v923_v56, %v916_v51  ;;  %v937_v23 = vsel %vm292_vm1, %v936_v52, %v871_v54 }
 0x290   :  { %v952_v13 = vpack.i.b16 %v909_v55, %v890_v2  ;;  %v954_v17 = vshrl.u32 %v909_v55, 16  ;;  %v928_v18 = vperm.slane %v924_v22, %v2417_v50  ;;  %v941_v21 = vperm.slane %v937_v23, %v2414_v37 }
 0x291   :  { %v892_v29 = vsel %vm292_vm1, 0, %v891_v57  ;;  %v910_v3 = vrot.slane %v909_v55, 4 }
 0x292   :  { %v1236_v25 = vsel %vm1234_vm3, %v952_v13, 0  ;;  %v955_v63 = vpack.i.b16 %v954_v17, %v953_v5  ;;  %v942_v26 = vrot.slane %v941_v21, 4  ;;  %v959_v15 = vshrl.u32 %v892_v29, 16 }
 0x293   :  { %1245 = vmatpush.bf16.msra.mxu3 %v1236_v25  ;;  %v911_v34 = vsel %vm292_vm1, 0, %v910_v3  ;;  %v929_v27 = vrot.slane %v928_v18, 4  ;;  %v965_v42 = vshrl.u32 %v928_v18, 16 }
 0x294   :  { %v1274_v0 = vsel %vm1234_vm3, %v955_v63, 0  ;;  %v943_v11 = vsel %vm292_vm1, %v942_v26, %v935_v8  ;;  %v958_v16 = vpack.i.b16 %v911_v34, %v892_v29  ;;  %v960_v35 = vshrl.u32 %v911_v34, 16 }
 0x295   :  { %1283 = vmatpush.bf16.msrb.mxu1 %v1274_v0  ;;  %v947_v36 = vperm.slane %v943_v11, %v2417_v50  ;;  %v930_v59 = vsel %vm292_vm1, 0, %v929_v27 }
 0x296   :  { %v1312_v30 = vsel %vm1234_vm3, %v958_v16, 0  ;;  %v961_v43 = vpack.i.b16 %v960_v35, %v959_v15  ;;  %v971_v62 = vshrl.u32 %v930_v59, 16 }
 0x297   :  { %v964_v38 = vpack.i.b16 %v947_v36, %v928_v18  ;;  %1321 = vmatpush.bf16.msrb.mxu3 %v1312_v30  ;;  %v966_v40 = vshrl.u32 %v947_v36, 16  ;;  %v948_v33 = vrot.slane %v947_v36, 4 }
 0x298   :  { %v1350_v39 = vsel %vm1234_vm3, %v961_v43, 0 }
 0x299   :  { %v1255_v44 = vsel %vm1234_vm3, %v964_v38, 0  ;;  %v967_v1 = vpack.i.b16 %v966_v40, %v965_v42  ;;  %1359 = vmatpush.bf16.msra.mxu1 %v1350_v39  ;;  %v949_v12 = vsel %vm292_vm1, 0, %v948_v33 }
 0x29a   :  { %1264 = vmatpush.bf16.msrb.mxu0 %v1255_v44  ;;  %v970_v7 = vpack.i.b16 %v949_v12, %v930_v59  ;;  %v972_v58 = vshrl.u32 %v949_v12, 16 }
 0x29b   :  { %v1293_v19 = vsel %vm1234_vm3, %v967_v1, 0 }
 0x29c   :  { %1302 = vmatpush.bf16.msrb.mxu2 %v1293_v19  ;;  %v1331_v28 = vsel %vm1234_vm3, %v970_v7, 0  ;;  %v973_v45 = vpack.i.b16 %v972_v58, %v971_v62 }
 0x29e   :  { %1340 = vmatpush.bf16.msra.mxu0 %v1331_v28  ;;  %v1369_v46 = vsel %vm1234_vm3, %v973_v45, 0 }
 0x2a0   :  { %1378 = vmatpush.bf16.msra.mxu2 %v1369_v46 }
 0x2d0   :  { %v1185_v6 = vpop.xlane.xlu1 %1184 }
 0x2d1   :  { %2066 = vrcp.f32 %v1185_v6 }
 0x2d4   :  { %v1194_v41 = vpop.xlane.xlu0 %1193 }
 0x2d5   :  { %2068 = vrcp.f32 %v1194_v41  ;;  %v1188_v47 = vpop.xlane.xlu2 %1187 }
 0x2d6   :  { %2070 = vrcp.f32 %v1188_v47 }
 0x2d7   :  { %v2067_v48 = vpop.eup %2066 }
 0x2d8   :  { %v1215_v49 = vmul.f32 %v2067_v48, %v2665_v9  ;;  %v1191_v31 = vpop.xlane.xlu1 %1190 }
 0x2d9   :  { %2072 = vrcp.f32 %v1191_v31 }
 0x2da   :  { %v1223_v2 = vpack.c.bf16 %v1215_v49, %v1215_v49 }
 0x2db   :  { %v2069_v51 = vpop.eup %2068 }
 0x2dc   :  { %v2071_v52 = vpop.eup %2070  ;;  %v1218_v53 = vmul.f32 %v2069_v51, %v2669_v4  ;;  %1951 = vmatmul.msk.bf16.vlgmr.msra.gmra.mxu3 %vm974_vm2, %v1223_v2 }
 0x2dd   :  { %v1216_v56 = vmul.f32 %v2071_v52, %v2671_v10 }
 0x2de   :  { %v1226_v54 = vpack.c.bf16 %v1218_v53, %v1218_v53 }
 0x2df   :  { %v2073_v55 = vpop.eup %2072  ;;  %v1224_v57 = vpack.c.bf16 %v1216_v56, %v1216_v56 }
 0x2e0   :  { %v1217_v61 = vmul.f32 %v2073_v55, %v2675_v14  ;;  %1954 = vmatmul.msk.bf16.vlgmr.msrb.gmra.mxu2 %vm974_vm2, %v1226_v54  ;;  %v1200_v5 = vpop.xlane.xlu1 %1199 }
 0x2e1   :  { %1952 = vmatmul.msk.bf16.vlgmr.msrb.gmra.mxu0 %vm974_vm2, %v1224_v57  ;;  %2074 = vrcp.f32 %v1200_v5 }
 0x2e2   :  { %v1225_v9 = vpack.c.bf16 %v1217_v61, %v1217_v61 }
 0x2e4   :  { %v1206_v22 = vpop.xlane.xlu2 %1205  ;;  %1953 = vmatmul.msk.bf16.vlgmr.msrb.gmra.mxu1 %vm974_vm2, %v1225_v9 }
 0x2e5   :  { %2076 = vrcp.f32 %v1206_v22  ;;  %v1197_v4 = vpop.xlane.xlu0 %1196 }
 0x2e6   :  { %2078 = vrcp.f32 %v1197_v4 }
 0x2e7   :  { %v2075_v23 = vpop.eup %2074 }
 0x2e8   :  { %v1220_v13 = vmul.f32 %v2075_v23, %v2682_v60 }
 0x2ea   :  { %v1228_v3 = vpack.c.bf16 %v1220_v13, %v1220_v13 }
 0x2eb   :  { %v2077_v10 = vpop.eup %2076 }
 0x2ec   :  { %v2079_v17 = vpop.eup %2078  ;;  %v1222_v14 = vmul.f32 %v2077_v10, %v2686_v24 }
 0x2ed   :  { %v1219_v18 = vmul.f32 %v2079_v17, %v2688_v32  ;;  %v1203_v21 = vpop.xlane.xlu0 %1202 }
 0x2ee   :  { %v1230_v29 = vpack.c.bf16 %v1222_v14, %v1222_v14  ;;  %2080 = vrcp.f32 %v1203_v21 }
 0x2ef   :  { %v1227_v25 = vpack.c.bf16 %v1219_v18, %v1219_v18 }
 0x2f0   :  { %1958 = vmatmul.msk.bf16.vlgmr.msra.gmra.mxu2 %vm974_vm2, %v1230_v29 }
 0x2f1   :  { %1955 = vmatmul.msk.bf16.vlgmr.msrb.gmra.mxu3 %vm974_vm2, %v1227_v25  ;;  %1956 = vmatmul.msk.bf16.vlgmr.msra.gmra.mxu0 %vm974_vm2, %v1228_v3 }
 0x2f4   :  { %v2081_v63 = vpop.eup %2080 }
 0x2f5   :  { %v1221_v8 = vmul.f32 %v2081_v63, %v2696_v20 }
 0x2f7   :  { %v1229_v60 = vpack.c.bf16 %v1221_v8, %v1221_v8 }
 0x2f9   :  { %1957 = vmatmul.msk.bf16.vlgmr.msra.gmra.mxu1 %vm974_vm2, %v1229_v60 }
 0x35e   :  { %v1266_v24 = vpop.f32.mrf.mxu0 }
 0x35f   :  { %v1247_v26 = vpop.f32.mrf.mxu3  ;;  %v1443_v16 = vrot.slane %v1266_v24, 4 }
 0x360   :  { %v1387_v40 = vrot.slane %v1247_v26, 4 }
 0x361   :  { %v1285_v32 = vpop.f32.mrf.mxu1 }
 0x362   :  { %v1399_v58 = vrot.slane %v1285_v32, 4 }
 0x363   :  { %v1304_v34 = vpop.f32.mrf.mxu2 }
 0x364   :  { %v1455_v43 = vrot.slane %v1304_v34, 4 }
 0x366   :  { %v1268_v15 = vpop.f32.mrf.mxu0 }
 0x367   :  { %v1249_v27 = vpop.f32.mrf.mxu3 }
 0x369   :  { %v1287_v0 = vpop.f32.mrf.mxu1 }
 0x36b   :  { %v1306_v11 = vpop.f32.mrf.mxu2 }
 0x36e   :  { %v1342_v35 = vpop.f32.mrf.mxu0 }
 0x36f   :  { %v1441_v36 = vrot.slane %v1342_v35, 4  ;;  %v1444_v30 = vsel %vm292_vm1, %v1342_v35, %v1443_v16 }
 0x370   :  { %v1452_v20 = vperm.slane %v1444_v30, %v2414_v37 }
 0x371   :  { %v1442_v42 = vsel %vm292_vm1, %v1441_v36, %v1266_v24 }
 0x372   :  { %v1448_v38 = vperm.slane %v1442_v42, %v2414_v37  ;;  %v1479_v1 = vrot.slane %v1452_v20, 4 }
 0x373   :  { %v1380_v59 = vpop.f32.mrf.mxu2 }
 0x374   :  { %v1453_v33 = vrot.slane %v1380_v59, 4  ;;  %v1456_v39 = vsel %vm292_vm1, %v1380_v59, %v1455_v43  ;;  %v1323_v44 = vpop.f32.mrf.mxu3  ;;  %v1467_v19 = vrot.slane %v1448_v38, 4 }
 0x375   :  { %v1464_v12 = vperm.slane %v1456_v39, %v2414_v37  ;;  %v1384_v7 = vrot.slane %v1323_v44, 4  ;;  %v1388_v62 = vsel %vm292_vm1, %v1323_v44, %v1387_v40 }
 0x376   :  { %v1454_v28 = vsel %vm292_vm1, %v1453_v33, %v1304_v34  ;;  %v1396_v45 = vperm.slane %v1388_v62, %v2414_v37  ;;  %v1344_v46 = vpop.f32.mrf.mxu0  ;;  %v1361_v6 = vpop.f32.mrf.mxu1 }
 0x377   :  { %v1460_v41 = vperm.slane %v1454_v28, %v2414_v37  ;;  %v1477_v47 = vrot.slane %v1464_v12, 4  ;;  %v1480_v48 = vsel %vm292_vm1, %v1464_v12, %v1479_v1  ;;  %v1386_v49 = vsel %vm292_vm1, %v1384_v7, %v1247_v26 }
 0x378   :  { %v1488_v31 = vperm.slane %v1480_v48, %v2417_v50  ;;  %v1392_v2 = vperm.slane %v1386_v49, %v2414_v37  ;;  %v1397_v51 = vrot.slane %v1361_v6, 4  ;;  %v1400_v54 = vsel %vm292_vm1, %v1361_v6, %v1399_v58 }
 0x379   :  { %v1465_v52 = vrot.slane %v1460_v41, 4  ;;  %v1468_v53 = vsel %vm292_vm1, %v1460_v41, %v1467_v19  ;;  %v1478_v56 = vsel %vm292_vm1, %v1477_v47, %v1452_v20  ;;  %v1423_v5 = vrot.slane %v1396_v45, 4 }
 0x37a   :  { %v1476_v55 = vperm.slane %v1468_v53, %v2417_v50  ;;  %v1484_v57 = vperm.slane %v1478_v56, %v2417_v50  ;;  %v1495_v61 = vrot.slane %v1488_v31, 4  ;;  %v1411_v22 = vrot.slane %v1392_v2, 4 }
 0x37b   :  { %v1466_v9 = vsel %vm292_vm1, %v1465_v52, %v1448_v38  ;;  %v1398_v4 = vsel %vm292_vm1, %v1397_v51, %v1285_v32  ;;  %v1408_v23 = vperm.slane %v1400_v54, %v2414_v37  ;;  %v1382_v10 = vpop.f32.mrf.mxu2 }
 0x37c   :  { %v1472_v13 = vperm.slane %v1466_v9, %v2417_v50  ;;  %v1491_v17 = vrot.slane %v1476_v55, 4  ;;  %v1493_v14 = vrot.slane %v1484_v57, 4  ;;  %v1496_v18 = vsel %vm292_vm1, 0.0, %v1495_v61  ;;  %v1325_v21 = vpop.f32.mrf.mxu3 }
 0x37d   :  { %v1562_v29 = vsel %vm292_vm1, %v1495_v61, %v1484_v57  ;;  %v1567_v3 = vrot.slane %v1496_v18, 4  ;;  %v1404_v25 = vperm.slane %v1398_v4, %v2414_v37  ;;  %v1421_v63 = vrot.slane %v1408_v23, 4 }
 0x37e   :  { %v1489_v8 = vrot.slane %v1472_v13, 4  ;;  %v1492_v60 = vsel %vm292_vm1, 0.0, %v1491_v17  ;;  %v1494_v24 = vsel %vm292_vm1, 0.0, %v1493_v14  ;;  %v1551_v26 = vsel %vm292_vm1, %v1491_v17, %v1472_v13  ;;  %v1363_v32 = vpop.f32.mrf.mxu1 }
 0x37f   :  { %v1556_v34 = vrot.slane %v1492_v60, 4  ;;  %v1566_v15 = vperm.slane %v1562_v29, %v2414_v37  ;;  %v1568_v27 = vsel %vm292_vm1, %v1567_v3, %v1494_v24  ;;  %v1409_v0 = vrot.slane %v1404_v25, 4 }
 0x380   :  { %v1572_v11 = vperm.slane %v1568_v27, %v2414_v37  ;;  %v1412_v16 = vsel %vm292_vm1, %v1404_v25, %v1411_v22  ;;  %v1422_v35 = vsel %vm292_vm1, %v1421_v63, %v1396_v45  ;;  %v1424_v36 = vsel %vm292_vm1, %v1408_v23, %v1423_v5 }
 0x381   :  { %v1587_v30 = vrot.slane %v1566_v15, 4  ;;  %v1410_v42 = vsel %vm292_vm1, %v1409_v0, %v1392_v2  ;;  %v1420_v20 = vperm.slane %v1412_v16, %v2417_v50  ;;  %v1428_v43 = vperm.slane %v1422_v35, %v2417_v50 }
 0x382   :  { %v1416_v38 = vperm.slane %v1410_v42, %v2417_v50  ;;  %v1432_v40 = vperm.slane %v1424_v36, %v2417_v50  ;;  %v1490_v59 = vsel %vm292_vm1, 0.0, %v1489_v8  ;;  %v1555_v33 = vperm.slane %v1551_v26, %v2414_v37 }
 0x383   :  { %v1435_v39 = vrot.slane %v1420_v20, 4  ;;  %v1437_v44 = vrot.slane %v1428_v43, 4  ;;  %v1557_v1 = vsel %vm292_vm1, %v1556_v34, %v1490_v59  ;;  %v1588_v12 = vsel %vm292_vm1, %v1572_v11, %v1587_v30  ;;  %v2001_v59 = vld [vmem:[#allocation7 + $0x8] sm:$0xff] }
 0x384   :  { %v1433_v7 = vrot.slane %v1416_v38, 4  ;;  %v1439_v62 = vrot.slane %v1432_v40, 4  ;;  %v1561_v58 = vperm.slane %v1557_v1, %v2414_v37  ;;  %v1575_v19 = vrot.slane %v1555_v33, 4  ;;  %1667 = vmatpush.bf16.msra.mxu3 %v2001_v59 }
 0x385   :  { %v1436_v28 = vsel %vm292_vm1, 0.0, %v1435_v39  ;;  %v1438_v45 = vsel %vm292_vm1, 0.0, %v1437_v44  ;;  %v1497_v46 = vsel %vm292_vm1, %v1435_v39, %v1416_v38  ;;  %v1596_v6 = vperm.slane %v1588_v12, %v2417_v50 }
 0x386   :  { %v1440_v41 = vsel %vm292_vm1, 0.0, %v1439_v62  ;;  %v1502_v47 = vrot.slane %v1436_v28, 4  ;;  %v1508_v48 = vsel %vm292_vm1, %v1439_v62, %v1428_v43  ;;  %v1434_v49 = vsel %vm292_vm1, 0.0, %v1433_v7 }
 0x387   :  { %v1512_v31 = vperm.slane %v1508_v48, %v2414_v37  ;;  %v1513_v2 = vrot.slane %v1440_v41, 4  ;;  %v1501_v51 = vperm.slane %v1497_v46, %v2414_v37  ;;  %v1576_v52 = vsel %vm292_vm1, %v1561_v58, %v1575_v19 }
 0x388   :  { %v1503_v53 = vsel %vm292_vm1, %v1502_v47, %v1434_v49  ;;  %v1584_v56 = vperm.slane %v1576_v52, %v2417_v50  ;;  %v1573_v54 = vrot.slane %v1561_v58, 4  ;;  %v1601_v22 = vrot.slane %v1596_v6, 4  ;;  %v2092_v52 = vld [vmem:[%s2964_s24] sm:$0xff] }
 0x389   :  { %v1514_v55 = vsel %vm292_vm1, %v1513_v2, %v1438_v45  ;;  %v1533_v57 = vrot.slane %v1512_v31, 4  ;;  %v1507_v61 = vperm.slane %v1503_v53, %v2414_v37  ;;  %v1521_v5 = vrot.slane %v1501_v51, 4 }
 0x38a   :  { %v1518_v9 = vperm.slane %v1514_v55, %v2414_v37  ;;  %v1574_v4 = vsel %vm292_vm1, %v1573_v54, %v1555_v33  ;;  %v1585_v17 = vrot.slane %v1572_v11, 4  ;;  %v1603_v21 = vrot.slane %v1584_v56, 4  ;;  %v2000_v33 = vld [vmem:[#allocation7] sm:$0xff] }
 0x38b   :  { %v1522_v23 = vsel %vm292_vm1, %v1507_v61, %v1521_v5  ;;  %v1519_v10 = vrot.slane %v1507_v61, 4  ;;  %v1580_v13 = vperm.slane %v1574_v4, %v2417_v50  ;;  %1668 = vmatpush.bf16.msra.mxu3 %v2000_v33 }
 0x38c   :  { %v1530_v14 = vperm.slane %v1522_v23, %v2417_v50  ;;  %v1534_v18 = vsel %vm292_vm1, %v1518_v9, %v1533_v57  ;;  %v1531_v29 = vrot.slane %v1518_v9, 4  ;;  %v1586_v37 = vsel %vm292_vm1, %v1585_v17, %v1566_v15  ;;  %v2093_v57 = vld [vmem:[%s2964_s24 + $0x8] sm:$0xff] }
 0x38d   :  { %v1542_v3 = vperm.slane %v1534_v18, %v2417_v50  ;;  %v1520_v25 = vsel %vm292_vm1, %v1519_v10, %v1501_v51  ;;  %v1599_v63 = vrot.slane %v1580_v13, 4  ;;  %v1592_v26 = vperm.slane %v1586_v37, %v2417_v50 }
 0x38e   :  { %v1549_v8 = vrot.slane %v1530_v14, 4  ;;  %v1526_v60 = vperm.slane %v1520_v25, %v2417_v50  ;;  %v1532_v24 = vsel %vm292_vm1, %v1531_v29, %v1512_v31  ;;  %v1604_v0 = vsel %vm292_vm1, %v1596_v6, %v1603_v21  ;;  %v2043_v31 = vld [vmem:[%s2947_s9] ss:$0 sm:$0xff] }
 0x38f   :  { %v1547_v32 = vrot.slane %v1542_v3, 4  ;;  %v1538_v34 = vperm.slane %v1532_v24, %v2417_v50  ;;  %v1597_v16 = vrot.slane %v1592_v26, 4  ;;  %v1602_v15 = vsel %vm292_vm1, %v1601_v22, %v1584_v56 }
 0x390   :  { %v1550_v27 = vsel %vm292_vm1, %v1542_v3, %v1549_v8  ;;  %v1545_v11 = vrot.slane %v1526_v60, 4  ;;  %v1600_v43 = vsel %vm292_vm1, %v1592_v26, %v1599_v63  ;;  %v2236_v9 = vmov 32.0  }
 0x391   :  { %v1548_v35 = vsel %vm292_vm1, %v1547_v32, %v1530_v14  ;;  %v2035_v36 = vpack.i.bf16 %v1604_v0, %v1550_v27  ;;  %v1543_v30 = vrot.slane %v1538_v34, 4  ;;  %v1598_v38 = vsel %vm292_vm1, %v1597_v16, %v1580_v13  ;;  %v2003_v32 = vld [vmem:[#allocation8 + $0x8] sm:$0xff]  ;;  %v2002_v27 = vld [vmem:[#allocation8] sm:$0xff] }
 0x392   :  { %v2030_v42 = vpack.i.bf16 %v1602_v15, %v1548_v35  ;;  %v1546_v20 = vsel %vm292_vm1, %v1538_v34, %v1545_v11  ;;  %2082 = vrcp.f32 %v2236_v9  ;;  %1770 = vmatpush.bf16.msrb.mxu0 %v2003_v32  ;;  %v2007_v0 = vld [vmem:[%s2950_s12 + $0x18] sm:$0xff] }
 0x393   :  { %2036 = vrot.lane.b32.xlu0 %v2035_v36, %s2233_s7  ;;  %v2025_v50 = vpack.i.bf16 %v1600_v43, %v1546_v20  ;;  %v1544_v40 = vsel %vm292_vm1, %v1543_v30, %v1526_v60  ;;  %1825 = vmatpush.bf16.msrb.mxu1 %v2007_v0 }
 0x394   :  { %2031 = vrot.lane.b32.xlu1 %v2030_v42, %s2234_s10 }
 0x395   :  { %2026 = vrot.lane.b32.xlu2 %v2025_v50, %s2235_s20 }
 0x396   :  { %1771 = vmatpush.bf16.msrb.mxu0 %v2002_v27 }
 0x398   :  { %v2083_v22 = vpop.eup %2082 }
 0x399   :  { %v1684_v4 = vmul.f32 32.0, %v2083_v22  ;;  %vm1688_vm6 = vweird.f32 %v2083_v22 }
 0x39b   :  { %v1685_v23 = vsub.f32 1.0, %v1684_v4 }
 0x39d   :  { %v1686_v10 = vmul.f32 %v2083_v22, %v1685_v23 }
 0x39f   :  { %v1687_v13 = vadd.f32 %v2083_v22, %v1686_v10 }
 0x3a1   :  { %v2885_v17 = vsel %vm1688_vm6, %v2083_v22, %v1687_v13 }
 0x3ef   :  { %v2027_v39 = vpop.permute.xlu2 %2026 }
 0x3f0   :  { %v2029_v44 = vunpack.i.h.bf16 %v2027_v39  ;;  %v2028_v1 = vunpack.i.l.bf16 %v2027_v39 }
 0x3f2   :  { %v1630_v45 = vsel %vm974_vm2, %v1598_v38, %v2029_v44  ;;  %v1629_v46 = vsel %vm974_vm2, %v1544_v40, %v2028_v1  ;;  %v2044_v44 = vld [vmem:[%s2952_s14] ss:$0 sm:$0xff] }
 0x405   :  { %v2037_v12 = vpop.permute.xlu0 %2036 }
 0x406   :  { %v2032_v7 = vpop.permute.xlu1 %2031  ;;  %v2039_v62 = vunpack.i.h.bf16 %v2037_v12  ;;  %v2038_v58 = vunpack.i.l.bf16 %v2037_v12 }
 0x407   :  { %v2034_v19 = vunpack.i.h.bf16 %v2032_v7  ;;  %v2033_v28 = vunpack.i.l.bf16 %v2032_v7 }
 0x409   :  { %v1632_v6 = vsel %vm1631_vm4, %v1629_v46, %v2033_v28  ;;  %v1633_v41 = vsel %vm1631_vm4, %v1630_v45, %v2034_v19 }
 0x40a   :  { %v1635_v47 = vsel %vm1634_vm5, %v1632_v6, %v2038_v58  ;;  %v1636_v48 = vsel %vm1634_vm5, %v1633_v41, %v2039_v62  ;;  %v2045_v62 = vld [vmem:[%s2953_s15] ss:$0 sm:$0xff]  ;;  %v2006_v41 = vld [vmem:[%s2950_s12 + $0x10] sm:$0xff] }
 0x40b   :  { %v1637_v49 = vpack.c.bf16 %v1636_v48, %v1635_v47  ;;  %1826 = vmatpush.bf16.msrb.mxu1 %v2006_v41  ;;  %v2005_v47 = vld [vmem:[%s2950_s12 + $0x8] sm:$0xff]  ;;  %v2004_v48 = vld [vmem:[%s2950_s12] sm:$0xff] }
 0x40d   :  { %1967 = vmatmul.msk.bf16.vlgmr.msra.gmra.mxu3 %vm152_vm0, %v1637_v49 }
 0x40f   :  { %1827 = vmatpush.bf16.msrb.mxu1 %v2005_v47 }
 0x413   :  { %1828 = vmatpush.bf16.msrb.mxu1 %v2004_v48 }
 0x490   :  { %v1670_v2 = vpop.f32.mrf.mxu3 }
 0x491   :  { %v1671_v51 = vadd.f32 %v2043_v31, %v1670_v2 }
 0x493   :  { %v1675_v53 = vadd.f32 %v2092_v52, %v1671_v51 }
 0x495   :  { %v1677_v56 = vsel %vm152_vm0, %v1675_v53, 0.0 }
 0x496   :  { %1678 = vadd.xlane.f32.xlu2 %v1677_v56 }
 0x498   :  { %v1672_v54 = vpop.f32.mrf.mxu3 }
 0x499   :  { %v1673_v55 = vadd.f32 %v2043_v31, %v1672_v54  ;;  %v2046_v31 = vld [vmem:[%s2949_s11] ss:$0 sm:$0xff] }
 0x49b   :  { %v1676_v61 = vadd.f32 %v2093_v57, %v1673_v55  ;;  %v2047_v55 = vld [vmem:[%s2951_s13] ss:$0 sm:$0xff] }
 0x49d   :  { %v1680_v5 = vsel %vm152_vm0, %v1676_v61, 0.0 }
 0x49e   :  { %1681 = vadd.xlane.f32.xlu0 %v1680_v5 }
 0x509   :  { %v1679_v14 = vpop.xlane.xlu2 %1678 }
 0x50a   :  { %v1690_v18 = vmul.f32 %v2885_v17, %v1679_v14 }
 0x50c   :  { %v1692_v21 = vsub.f32 %v1675_v53, %v1690_v18 }
 0x50e   :  { %v1694_v29 = vmul.f32 %v1692_v21, %v1692_v21 }
 0x510   :  { %v1696_v3 = vsel %vm152_vm0, %v1694_v29, 0.0 }
 0x511   :  { %v1682_v25 = vpop.xlane.xlu0 %1681  ;;  %1697 = vadd.xlane.f32.xlu1 %v1696_v3 }
 0x512   :  { %v1691_v37 = vmul.f32 %v2885_v17, %v1682_v25 }
 0x514   :  { %v1693_v63 = vsub.f32 %v1676_v61, %v1691_v37 }
 0x516   :  { %v1695_v8 = vmul.f32 %v1693_v63, %v1693_v63 }
 0x518   :  { %v1699_v60 = vsel %vm152_vm0, %v1695_v8, 0.0 }
 0x519   :  { %1700 = vadd.xlane.f32.xlu2 %v1699_v60 }
 0x584   :  { %v1698_v24 = vpop.xlane.xlu1 %1697 }
 0x585   :  { %v1702_v26 = vmul.f32 %v1698_v24, %v2885_v17 }
 0x587   :  { %v1704_v34 = vadd.f32 1e-05, %v1702_v26 }
 0x589   :  { %2084 = vrsqrt.f32 %v1704_v34  ;;  %vm1712_vm8 = vweird.f32 %v1704_v34 }
 0x58c   :  { %v1701_v11 = vpop.xlane.xlu2 %1700 }
 0x58d   :  { %v1703_v16 = vmul.f32 %v1701_v11, %v2885_v17 }
 0x58f   :  { %v2085_v35 = vpop.eup %2084  ;;  %v1705_v15 = vadd.f32 1e-05, %v1703_v16 }
 0x590   :  { %v1707_v36 = vmul.f32 %v2085_v35, %v1704_v34  ;;  %vm1713_vm7 = vweird.f32 %v2085_v35 }
 0x591   :  { %2086 = vrsqrt.f32 %v1705_v15  ;;  %vm1714_vm9 = vmor %vm1712_vm8, %vm1713_vm7  ;;  %vm1722_vm11 = vweird.f32 %v1705_v15 }
 0x592   :  { %v1708_v30 = vmul.f32 %v2085_v35, %v1707_v36 }
 0x594   :  { %v1709_v42 = vmul.f32 0.5, %v1708_v30 }
 0x596   :  { %v1710_v20 = vsub.f32 1.5, %v1709_v42 }
 0x597   :  { %v2087_v43 = vpop.eup %2086 }
 0x598   :  { %v1711_v38 = vmul.f32 %v2085_v35, %v1710_v20  ;;  %v1717_v50 = vmul.f32 %v2087_v43, %v1705_v15  ;;  %vm1723_vm10 = vweird.f32 %v2087_v43  ;;  %v2048_v20 = vld [vmem:[%s2954_s16] ss:$0 sm:$0xff] }
 0x599   :  { %vm1724_vm12 = vmor %vm1722_vm11, %vm1723_vm10 }
 0x59a   :  { %v1718_v40 = vmul.f32 %v2087_v43, %v1717_v50  ;;  %v1715_v59 = vsel %vm1714_vm9, %v2085_v35, %v1711_v38 }
 0x59b   :  { %v1726_v1 = vmul.f32 %v1715_v59, %v1692_v21 }
 0x59c   :  { %v1719_v33 = vmul.f32 0.5, %v1718_v40 }
 0x59d   :  { %v1732_v58 = vmul.f32 %v2044_v44, %v1726_v1 }
 0x59e   :  { %v1720_v39 = vsub.f32 1.5, %v1719_v33 }
 0x59f   :  { %v1738_v45 = vadd.f32 %v2045_v62, %v1732_v58 }
 0x5a0   :  { %v1721_v12 = vmul.f32 %v2087_v43, %v1720_v39 }
 0x5a2   :  { %v1725_v7 = vsel %vm1724_vm12, %v2087_v43, %v1721_v12 }
 0x5a3   :  { %v1727_v19 = vmul.f32 %v1725_v7, %v1693_v63 }
 0x5a5   :  { %v1733_v28 = vmul.f32 %v2044_v44, %v1727_v19 }
 0x5a7   :  { %v1739_v46 = vadd.f32 %v2045_v62, %v1733_v28 }
 0x5a9   :  { %v1740_v6 = vpack.c.bf16 %v1739_v46, %v1738_v45 }
 0x5ab   :  { %1976 = vmatmul.msk.bf16.vlgmr.msrb.gmra.mxu0 %vm152_vm0, %v1740_v6 }
 0x628   :  { %v1773_v49 = vpop.f32.mrf.mxu0 }
 0x629   :  { %v1774_v2 = vadd.f32 %v2046_v31, %v1773_v49 }
 0x62b   :  { %v1778_v53 = vmax.f32 %v1774_v2, 0.0 }
 0x630   :  { %v1775_v51 = vpop.f32.mrf.mxu0 }
 0x631   :  { %v1776_v52 = vadd.f32 %v2046_v31, %v1775_v51 }
 0x633   :  { %v1779_v56 = vmax.f32 %v1776_v52, 0.0 }
 0x635   :  { %v1780_v54 = vpack.c.bf16 %v1779_v56, %v1778_v53 }
 0x637   :  { %1993 = vmatmul.msk.bf16.vlgmr.msrb.gmra.mxu1 %vm1817_vm13, %v1780_v54 }
 0x6b4   :  { %v1830_v57 = vpop.f32.mrf.mxu1 }
 0x6b5   :  { %v1831_v61 = vadd.f32 %v2047_v55, %v1830_v57 }
 0x6b7   :  { %v1835_v5 = vadd.f32 %v1831_v61, %v1738_v45 }
 0x6b9   :  { %v1837_v9 = vsel %vm152_vm0, %v1835_v5, 0.0 }
 0x6ba   :  { %1838 = vadd.xlane.f32.xlu0 %v1837_v9 }
 0x6bc   :  { %v1832_v22 = vpop.f32.mrf.mxu1 }
 0x6bd   :  { %v1833_v4 = vadd.f32 %v2047_v55, %v1832_v22 }
 0x6bf   :  { %v1836_v23 = vadd.f32 %v1833_v4, %v1739_v46 }
 0x6c1   :  { %v1840_v10 = vsel %vm152_vm0, %v1836_v23, 0.0 }
 0x6c2   :  { %1841 = vadd.xlane.f32.xlu1 %v1840_v10 }
 0x72d   :  { %v1839_v13 = vpop.xlane.xlu0 %1838 }
 0x72e   :  { %v1843_v14 = vmul.f32 %v1839_v13, %v2885_v17 }
 0x730   :  { %v1845_v18 = vsub.f32 %v1835_v5, %v1843_v14 }
 0x732   :  { %v1847_v21 = vmul.f32 %v1845_v18, %v1845_v18 }
 0x734   :  { %v1849_v29 = vsel %vm152_vm0, %v1847_v21, 0.0 }
 0x735   :  { %v1842_v3 = vpop.xlane.xlu1 %1841  ;;  %1850 = vadd.xlane.f32.xlu2 %v1849_v29 }
 0x736   :  { %v1844_v25 = vmul.f32 %v1842_v3, %v2885_v17 }
 0x738   :  { %v1846_v37 = vsub.f32 %v1836_v23, %v1844_v25 }
 0x73a   :  { %v1848_v63 = vmul.f32 %v1846_v37, %v1846_v37 }
 0x73c   :  { %v1852_v8 = vsel %vm152_vm0, %v1848_v63, 0.0 }
 0x73d   :  { %1853 = vadd.xlane.f32.xlu0 %v1852_v8 }
 0x7a8   :  { %v1851_v60 = vpop.xlane.xlu2 %1850 }
 0x7a9   :  { %v1855_v24 = vmul.f32 %v1851_v60, %v2885_v17 }
 0x7ab   :  { %v1857_v26 = vadd.f32 1e-05, %v1855_v24 }
 0x7ad   :  { %2088 = vrsqrt.f32 %v1857_v26  ;;  %vm1865_vm15 = vweird.f32 %v1857_v26 }
 0x7b0   :  { %v1854_v32 = vpop.xlane.xlu0 %1853 }
 0x7b1   :  { %v1856_v34 = vmul.f32 %v1854_v32, %v2885_v17  ;;  %v2049_v17 = vld [vmem:[%s2955_s17] ss:$0 sm:$0xff]  ;;  %s2238_s17 = smov 128  }
 0x7b3   :  { %v2089_v27 = vpop.eup %2088  ;;  %v1858_v0 = vadd.f32 1e-05, %v1856_v34 }
 0x7b4   :  { %v1860_v11 = vmul.f32 %v2089_v27, %v1857_v26  ;;  %vm1866_vm14 = vweird.f32 %v2089_v27 }
 0x7b5   :  { %2090 = vrsqrt.f32 %v1858_v0  ;;  %vm1867_vm1 = vmor %vm1865_vm15, %vm1866_vm14  ;;  %vm1875_vm3 = vweird.f32 %v1858_v0 }
 0x7b6   :  { %v1861_v16 = vmul.f32 %v2089_v27, %v1860_v11 }
 0x7b8   :  { %v1862_v35 = vmul.f32 0.5, %v1861_v16 }
 0x7ba   :  { %v1863_v15 = vsub.f32 1.5, %v1862_v35 }
 0x7bb   :  { %v2091_v36 = vpop.eup %2090 }
 0x7bc   :  { %v1864_v30 = vmul.f32 %v2089_v27, %v1863_v15  ;;  %v1870_v42 = vmul.f32 %v2091_v36, %v1858_v0  ;;  %vm1876_vm2 = vweird.f32 %v2091_v36 }
 0x7bd   :  { %vm1877_vm4 = vmor %vm1875_vm3, %vm1876_vm2 }
 0x7be   :  { %v1868_v43 = vsel %vm1867_vm1, %v2089_v27, %v1864_v30  ;;  %v1871_v38 = vmul.f32 %v2091_v36, %v1870_v42 }
 0x7bf   :  { %v1879_v50 = vmul.f32 %v1868_v43, %v1845_v18 }
 0x7c0   :  { %v1872_v40 = vmul.f32 0.5, %v1871_v38 }
 0x7c1   :  { %v1885_v59 = vmul.f32 %v2048_v20, %v1879_v50 }
 0x7c2   :  { %v1873_v33 = vsub.f32 1.5, %v1872_v40 }
 0x7c3   :  { %v1891_v39 = vadd.f32 %v2049_v17, %v1885_v59 }
 0x7c4   :  { %v1874_v44 = vmul.f32 %v2091_v36, %v1873_v33 }
 0x7c5   :  { %1893 = vst.msk [vmem:[#allocation10] sm:$0xff] %vm152_vm0, %v1891_v39 }
 0x7c6   :  { %v1878_v1 = vsel %vm1877_vm4, %v2091_v36, %v1874_v44 }
 0x7c7   :  { %v1880_v12 = vmul.f32 %v1878_v1, %v1846_v37 }
 0x7c9   :  { %v1886_v7 = vmul.f32 %v2048_v20, %v1880_v12 }
 0x7cb   :  { %v1892_v62 = vadd.f32 %v2049_v17, %v1886_v7 }
 0x7cd   :  { %1894 = vst.msk [vmem:[#allocation10 + $0x8] sm:$0xff] %vm152_vm0, %v1892_v62 }
 0x7ce   :  { %1907 = dma.vmem_to_hbm [thread:$0]  %s1900_s21, 256, %s1902_s2, [#allocation4], %s2238_s17, %s2238_s17, %s2235_s20  }
 0x7cf   :  { %2220 = dma.done.wait [#allocation4], 256  }
 0x7d0   :  { %2221 = vsyncadd [#allocation4], 4294967040 }
 0x7d1   :  { %1912 = vsyncpa [#allocation3], 1 }
 0x7d2   :  { %1913 = vsyncpa [#allocation6], 1 }
 0x7d3   :  { %1914 = vsyncpa [#allocation9], 1 }
 0x7d4   :  { %1915 = vsyncpa [#allocation4], 1 }

</bundles_post_ra>
